<compile_context>
chip_gen: v6e
topology: v6e:2x2x1
jax: 0.10.0
libtpu: 0.0.40
codegen_flags: <defaults>
</compile_context>

<pallas_src>
import functools

import numpy as np

import jax
import jax.numpy as jnp
from jax import lax
from jax.experimental import pallas as pl
from jax.experimental.pallas import tpu as pltpu


# ------------------------------ Pallas kernel ------------------------------- #

def _fused_block_kernel(x_ref, b1_ref, B1_ref, B2_ref, b2_ref, G_ref, beta_ref,
                        o_ref, l1_ref, upad_ref, *, H, W, Cin, C, r, NB):
    """Whole ResidualBlockUpsample for NB batch elements, lane-dense row layout.

    x_ref:    (NB, H, W*Cin)       input rows, lane-dense (w, cin)
    b1_ref:   (1, NQ)              merged conv1 bias (phase-major columns)
    B1_ref:   (3*W*Cin, NQ)        ky-stacked banded conv1 weights (subpel | identity)
    B2_ref:   (3*W2*C, LN)         ky-stacked banded conv2 weights (upsampled resolution)
    b2_ref:   (1, LN)
    G_ref:    (LN, LN)             block-diagonal gamma^T for the IGDN 1x1 conv
    beta_ref: (1, LN)
    o_ref:    (NB, r, H, LN)       output rows split by row phase (interleaved by wrapper)
    l1_ref:   (NB*H, 3*W*Cin)      VMEM scratch: conv1 LHS, [above | same | below] taps
    upad_ref: (r, NB*(H+2), LN)    VMEM scratch: activated rows per phase, 1-row halo
    """
    f32 = jnp.float32
    W2 = W * r
    LN = W2 * C                       # lane width of one upsampled row (128 in the test)
    K1 = W * Cin

    z1 = jnp.zeros((1, K1), f32)
    zL = jnp.zeros((1, LN), f32)

    # ---- stage conv1 LHS: three row-shifted taps as lane blocks (ky = 0, 1, 2) ----
    # Only the two halo rows per image are zeroed; everything else is overwritten.
    for n in range(NB):
        rb = n * H
        l1_ref[rb:rb + 1, 0:K1] = z1                             # row -1 (ky=0 tap)
        l1_ref[rb + 1:rb + H, 0:K1] = x_ref[n, 0:H - 1]
        l1_ref[rb:rb + H, K1:2 * K1] = x_ref[n]                  # ky=1 tap
        l1_ref[rb:rb + H - 1, 2 * K1:3 * K1] = x_ref[n, 1:H]     # ky=2 tap
        l1_ref[rb + H - 1:rb + H, 2 * K1:3 * K1] = z1            # row H

    # ---- merged conv3x3 (subpel branch + identity branch) as ONE MXU matmul ----
    out1 = jnp.dot(l1_ref[...].astype(B1_ref.dtype), B1_ref[...],
                   preferred_element_type=f32) + b1_ref[...]

    # conv1 columns are ordered (branch, row-phase i, w, col-phase j, c): the pixel
    # shuffle of either branch is a contiguous LN-lane slice per row phase.
    sub = out1[:, :r * LN]
    sub = jnp.where(sub >= 0, sub, f32(0.01) * sub)              # LeakyReLU (subpel only)
    idb = out1[:, r * LN:]                                       # identity branch

    # ---- stage activated rows per row phase (1-row zero halo per image) ----
    for n in range(NB):
        ub = n * (H + 2)
        for i in range(r):
            upad_ref[i, ub:ub + 1, :] = zL
            upad_ref[i, ub + 1:ub + 1 + H, :] = sub[n * H:(n + 1) * H,
                                                    i * LN:(i + 1) * LN]
            upad_ref[i, ub + 1 + H:ub + 2 + H, :] = zL

    # ---- conv3x3 at upsampled resolution + inverse GDN + residual, per output phase ----
    for i_out in range(r):
        taps = []
        for ky in range(3):
            t = i_out + ky - 1                 # upsampled-row offset of this tap
            ph, dh = t % r, t // r             # source row phase / source row shift
            pieces = [upad_ref[ph, n * (H + 2) + 1 + dh:n * (H + 2) + 1 + dh + H, :]
                      for n in range(NB)]
            taps.append(pieces[0] if NB == 1 else jnp.concatenate(pieces, axis=0))
        L2 = jnp.concatenate(taps, axis=1)     # (NB*H, 3*LN), 128-lane-tile aligned
        c = jnp.dot(L2.astype(B2_ref.dtype), B2_ref[...],
                    preferred_element_type=f32) + b2_ref[...]
        # inverse GDN: c * sqrt(beta + (c*c) @ blockdiag(gamma^T)) -- all 128-lane dense
        y = jnp.dot((c * c).astype(G_ref.dtype), G_ref[...],
                    preferred_element_type=f32) + beta_ref[...]
        res = c * jnp.sqrt(y) + idb[:, i_out * LN:(i_out + 1) * LN]
        for n in range(NB):
            o_ref[n, i_out] = res[n * H:(n + 1) * H].astype(o_ref.dtype)


# ------------------------ wrapper-side weight packing ------------------------ #

def _banded_conv_weights(w_hwio, width):
    """Per-ky block-Toeplitz matrices for a 3x3 SAME conv in lane-dense row layout.

    No width halo: out-of-range kx taps are clipped (identical to zero padding).
    Returns (3, width*Cin, width*Cout) with
    B[ky][w_in*Cin + ci, w_out*Cout + co] = w_hwio[ky, w_in-w_out+1, ci, co].
    """
    Cin, Cout = int(w_hwio.shape[2]), int(w_hwio.shape[3])
    mats = []
    for ky in range(3):
        tot = jnp.zeros((width * Cin, width * Cout), jnp.float32)
        for kx in range(3):
            shift = np.zeros((width, width), np.float32)
            for w_out in range(width):
                w_in = w_out + kx - 1
                if 0 <= w_in < width:
                    shift[w_in, w_out] = 1.0
            tot = tot + jnp.kron(jnp.asarray(shift), w_hwio[ky, kx].astype(jnp.float32))
        mats.append(tot)
    return jnp.stack(mats)


def _conv1_banded_phase_major(w_sub, w_up, W, Cin, C, r):
    """Merged (subpel | identity) banded conv1 weights, ky-stacked along rows, columns
    reordered so the pixel-shuffled output is a contiguous lane slice:
    column order = (branch, row-phase i, w, col-phase j, c)."""
    b_sub = _banded_conv_weights(w_sub, W)          # (3, W*Cin, W*C*r*r), cols (w, c, i, j)
    b_up = _banded_conv_weights(w_up, W)
    rows = W * Cin
    nat = jnp.stack([b_sub, b_up], axis=2)          # (3, rows, 2, W*C*r*r)
    nat = nat.reshape(3, rows, 2, W, C, r, r)       # (ky, rows, b, w, c, i, j)
    nat = jnp.transpose(nat, (0, 1, 2, 5, 3, 6, 4)) # (ky, rows, b, i, w, j, c)
    return nat.reshape(3 * rows, 2 * r * W * r * C)


def _conv1_bias_phase_major(b_sub, b_up, W, C, r):
    bb = jnp.stack([b_sub, b_up]).reshape(2, C, r, r)           # (branch, c, i, j)
    bb = jnp.transpose(bb, (0, 2, 3, 1))                        # (branch, i, j, c)
    bb = jnp.broadcast_to(bb[:, :, None, :, :], (2, r, W, r, C))
    return bb.reshape(1, 2 * r * W * r * C)


def _pick_batch_block(N, H):
    """Largest divisor of N that keeps the stacked M within ~128 MXU rows while leaving
    >= 2 grid steps (so a v7x megacore keeps both TensorCores busy)."""
    target = max(1, 128 // max(H, 1))
    best = 1
    for d in range(1, N + 1):
        if N % d == 0 and d <= target and N // d >= 2:
            best = d
    return best


def residual_block_upsample(x_nchw, params, r=2, batch_block=None,
                            mxu_dtype=jnp.float32):
    N, Cin, H, W = x_nchw.shape
    C = params["w_conv"].shape[-1]                 # out_ch
    H2, W2 = H * r, W * r
    LN = W2 * C
    NQ = 2 * r * LN
    K1 = W * Cin

    NB = _pick_batch_block(N, H) if batch_block is None else int(batch_block)
    assert N % NB == 0, f"batch_block={NB} must divide N={N}"

    # NCHW -> NHWC -> lane-dense rows (free reshape in XLA)
    x = jnp.transpose(x_nchw, (0, 2, 3, 1)).reshape(N, H, W * Cin)

    B1 = _conv1_banded_phase_major(params["w_sub"], params["w_up"],
                                   W, Cin, C, r).astype(mxu_dtype)   # (3*K1, NQ)
    b1 = _conv1_bias_phase_major(params["b_sub"], params["b_up"], W, C, r)
    B2 = _banded_conv_weights(params["w_conv"], W2).reshape(3 * W2 * C, LN).astype(mxu_dtype)
    b2 = jnp.tile(params["b_conv"], W2).reshape(1, LN)
    G = jnp.kron(jnp.eye(W2, dtype=jnp.float32), params["gamma"].T).astype(mxu_dtype)
    beta = jnp.tile(params["beta"], W2).reshape(1, LN)

    # Raise the scoped VMEM limit only when the packed weights actually need it
    # (matters when scaling W on v5e's 16 MiB / v7x's 32 MiB scoped defaults).
    itm = jnp.dtype(mxu_dtype).itemsize
    est = (2 * 4 * (NB * H * K1 + NB * r * H * LN)                 # x / out blocks (x2 buf)
           + 2 * itm * (3 * K1 * NQ + 3 * LN * LN + LN * LN)        # weight tensors
           + 2 * 4 * (NQ + 3 * LN)                                  # biases / beta
           + 4 * (NB * H * 3 * K1 + r * NB * (H + 2) * LN))         # VMEM scratch
    vmem_limit = int(1.5 * est) if est > 12 * (1 << 20) else None

    kernel = functools.partial(_fused_block_kernel, H=H, W=W, Cin=Cin, C=C, r=r, NB=NB)
    out = pl.pallas_call(
        kernel,
        out_shape=jax.ShapeDtypeStruct((N, r, H, LN), jnp.float32),
        grid=(N // NB,),
        in_specs=[
            pl.BlockSpec((NB, H, W * Cin), lambda g: (g, 0, 0)),
            pl.BlockSpec((1, NQ), lambda g: (0, 0)),
            pl.BlockSpec((3 * K1, NQ), lambda g: (0, 0)),
            pl.BlockSpec((3 * W2 * C, LN), lambda g: (0, 0)),
            pl.BlockSpec((1, LN), lambda g: (0, 0)),
            pl.BlockSpec((LN, LN), lambda g: (0, 0)),
            pl.BlockSpec((1, LN), lambda g: (0, 0)),
        ],
        out_specs=pl.BlockSpec((NB, r, H, LN), lambda g: (g, 0, 0, 0)),
        scratch_shapes=[
            pltpu.VMEM((NB * H, 3 * K1), jnp.float32),
            pltpu.VMEM((r, NB * (H + 2), LN), jnp.float32),
        ],
        compiler_params=pltpu.CompilerParams(
            dimension_semantics=("parallel",),
            vmem_limit_bytes=vmem_limit),
    )(x, b1, B1, B2, b2, G, beta)

    # interleave the row phases, then NHWC -> NCHW (tiny final transpose in XLA)
    out = out.reshape(N, r, H, W2, C)
    out = jnp.transpose(out, (0, 2, 1, 3, 4)).reshape(N, H2, W2, C)
    return jnp.transpose(out, (0, 3, 1, 2))


# --------------------------- pure-JAX reference ------------------------------ #

def _conv3x3_ref(x_nhwc, w_hwio, b):
    y = lax.conv_general_dilated(x_nhwc, w_hwio, (1, 1), "SAME",
                                 dimension_numbers=("NHWC", "HWIO", "NHWC"))
    return y + b


def pixel_shuffle_nhwc(x, r):
    """PixelShuffle with PyTorch channel ordering (c*r*r + i*r + j)."""
    N, H, W, Cr2 = x.shape
    C = Cr2 // (r * r)
    x = x.reshape(N, H, W, C, r, r)
    x = jnp.transpose(x, (0, 1, 4, 2, 5, 3))
    return x.reshape(N, H * r, W * r, C)


def residual_block_upsample_ref(x_nchw, params, r=2):
    x = jnp.transpose(x_nchw, (0, 2, 3, 1))
    u1 = pixel_shuffle_nhwc(_conv3x3_ref(x, params["w_sub"], params["b_sub"]), r)
    a = jnp.where(u1 >= 0, u1, 0.01 * u1)
    c = _conv3x3_ref(a, params["w_conv"], params["b_conv"])
    y = jnp.einsum("nhwc,dc->nhwd", c * c, params["gamma"]) + params["beta"]
    ig = c * jnp.sqrt(y)
    identity = pixel_shuffle_nhwc(_conv3x3_ref(x, params["w_up"], params["b_up"]), r)
    return jnp.transpose(ig + identity, (0, 3, 1, 2))


# ----------------------------------- main ------------------------------------ #

if __name__ == "__main__":
    in_ch, out_ch, r = 4, 4, 2
    N, H, W = 2, 16, 16

    key = jax.random.PRNGKey(0)
    ks = jax.random.split(key, 9)
    params = {
        # subpel_conv: Conv2d(in_ch, out_ch*r^2, 3), HWIO
        "w_sub": 0.1 * jax.random.normal(ks[0], (3, 3, in_ch, out_ch * r * r), jnp.float32),
        "b_sub": 0.1 * jax.random.normal(ks[1], (out_ch * r * r,), jnp.float32),
        # conv3x3(out_ch, out_ch)
        "w_conv": 0.1 * jax.random.normal(ks[2], (3, 3, out_ch, out_ch), jnp.float32),
        "b_conv": 0.1 * jax.random.normal(ks[3], (out_ch,), jnp.float32),
        # upsample (identity) branch: Conv2d(in_ch, out_ch*r^2, 3)
        "w_up": 0.1 * jax.random.normal(ks[4], (3, 3, in_ch, out_ch * r * r), jnp.float32),
        "b_up": 0.1 * jax.random.normal(ks[5], (out_ch * r * r,), jnp.float32),
        # IGDN params (positive, emulates GDN default init)
        "gamma": 0.1 * jnp.eye(out_ch, dtype=jnp.float32)
                 + 0.01 * jnp.abs(jax.random.normal(ks[6], (out_ch, out_ch), jnp.float32)),
        "beta": 1.0 + 0.1 * jnp.abs(jax.random.normal(ks[7], (out_ch,), jnp.float32)),
    }

    x = jax.random.normal(ks[8], (N, in_ch, H, W), jnp.float32)   # NCHW like PyTorch
    ref = residual_block_upsample_ref(x, params, r)

    # 1) default config (heuristic batch block -> 2 parallel grid steps for megacore)
    fwd = jax.jit(lambda xx: residual_block_upsample(xx, params, r))
    out = fwd(x)
    jax.block_until_ready(out)
    assert out.shape == (N, out_ch, H * r, W * r), out.shape
    err = float(jnp.max(jnp.abs(out - ref)))
    assert err < 1e-3, f"mismatch vs reference (default): {err}"

    # 2) batch rows stacked into the MXU M dimension (NB=2 -> one grid step, M doubled)
    fwd2 = jax.jit(lambda xx: residual_block_upsample(xx, params, r, batch_block=2))
    out2 = fwd2(x)
    jax.block_until_ready(out2)
    err2 = float(jnp.max(jnp.abs(out2 - ref)))
    assert err2 < 1e-3, f"mismatch vs reference (batch_block=2): {err2}"

    # 3) bf16 MXU operands (the v6e/v7x option) -- loose sanity tolerance only
    fwd3 = jax.jit(lambda xx: residual_block_upsample(xx, params, r,
                                                      mxu_dtype=jnp.bfloat16))
    out3 = fwd3(x)
    jax.block_until_ready(out3)
    err3 = float(jnp.max(jnp.abs(out3 - ref)))
    assert err3 < 1e-1, f"mismatch vs reference (bf16 MXU): {err3}"

    print("KERNEL_OK")
</pallas_src>

<mosaic_0001>
module attributes {stable_mosaic.version = 11 : i64} {
  func.func @_fused_block_kernel(%arg0: i32, %arg1: memref<1x16x64xf32, #tpu.memory_space<vmem>>, %arg2: memref<1x512xf32, #tpu.memory_space<vmem>>, %arg3: memref<192x512xf32, #tpu.memory_space<vmem>>, %arg4: memref<384x128xf32, #tpu.memory_space<vmem>>, %arg5: memref<1x128xf32, #tpu.memory_space<vmem>>, %arg6: memref<128x128xf32, #tpu.memory_space<vmem>>, %arg7: memref<1x128xf32, #tpu.memory_space<vmem>>, %arg8: memref<1x2x16x128xf32, #tpu.memory_space<vmem>>, %arg9: memref<16x192xf32, #tpu.memory_space<vmem>>, %arg10: memref<2x18x128xf32, #tpu.memory_space<vmem>>) attributes {dimension_semantics = [#tpu.dimension_semantics<parallel>], iteration_bounds = array<i64: 2>, scalar_prefetch = 0 : i64, scratch_operands = 2 : i64, tpu.core_type = #tpu.core_type<tc>, window_params = [{transform_indices = @transform_0, window_bounds = array<i64: 1, 16, 64>}, {pipeline_mode = #tpu.pipeline_mode<synchronous>, transform_indices = @transform_1, window_bounds = array<i64: 1, 512>}, {pipeline_mode = #tpu.pipeline_mode<synchronous>, transform_indices = @transform_2, window_bounds = array<i64: 192, 512>}, {pipeline_mode = #tpu.pipeline_mode<synchronous>, transform_indices = @transform_3, window_bounds = array<i64: 384, 128>}, {pipeline_mode = #tpu.pipeline_mode<synchronous>, transform_indices = @transform_4, window_bounds = array<i64: 1, 128>}, {pipeline_mode = #tpu.pipeline_mode<synchronous>, transform_indices = @transform_5, window_bounds = array<i64: 128, 128>}, {pipeline_mode = #tpu.pipeline_mode<synchronous>, transform_indices = @transform_6, window_bounds = array<i64: 1, 128>}, {transform_indices = @transform_7, window_bounds = array<i64: 1, 2, 16, 128>}]} {
    %cst = arith.constant 0.000000e+00 : f32
    %0 = vector.broadcast %cst : f32 to vector<1x64xf32>
    %cst_0 = arith.constant 0.000000e+00 : f32
    %1 = vector.broadcast %cst_0 : f32 to vector<1x128xf32>
    %c0 = arith.constant 0 : index
    %c0_1 = arith.constant 0 : index
    %2 = vector.load %arg9[%c0, %c0_1] : memref<16x192xf32, #tpu.memory_space<vmem>>, vector<1x64xf32>
    tpu.vector_store %arg9[%c0, %c0_1], %0 {strides = array<i32>} : memref<16x192xf32, #tpu.memory_space<vmem>>, vector<1x64xf32>,
    %c0_2 = arith.constant 0 : index
    %c0_3 = arith.constant 0 : index
    %c0_4 = arith.constant 0 : index
    %3 = vector.load %arg1[%c0_2, %c0_3, %c0_4] : memref<1x16x64xf32, #tpu.memory_space<vmem>>, vector<1x15x64xf32>
    %4 = vector.shape_cast %3 : vector<1x15x64xf32> to vector<15x64xf32>
    %c1 = arith.constant 1 : index
    %c0_5 = arith.constant 0 : index
    %5 = vector.load %arg9[%c1, %c0_5] : memref<16x192xf32, #tpu.memory_space<vmem>>, vector<15x64xf32>
    tpu.vector_store %arg9[%c1, %c0_5], %4 {strides = array<i32>} : memref<16x192xf32, #tpu.memory_space<vmem>>, vector<15x64xf32>,
    %c0_6 = arith.constant 0 : index
    %c0_7 = arith.constant 0 : index
    %c0_8 = arith.constant 0 : index
    %6 = vector.load %arg1[%c0_6, %c0_7, %c0_8] : memref<1x16x64xf32, #tpu.memory_space<vmem>>, vector<1x16x64xf32>
    %7 = vector.shape_cast %6 : vector<1x16x64xf32> to vector<16x64xf32>
    %c0_9 = arith.constant 0 : index
    %c64 = arith.constant 64 : index
    %8 = vector.load %arg9[%c0_9, %c64] : memref<16x192xf32, #tpu.memory_space<vmem>>, vector<16x64xf32>
    tpu.vector_store %arg9[%c0_9, %c64], %7 {strides = array<i32>} : memref<16x192xf32, #tpu.memory_space<vmem>>, vector<16x64xf32>,
    %c0_10 = arith.constant 0 : index
    %c1_11 = arith.constant 1 : index
    %c0_12 = arith.constant 0 : index
    %9 = vector.load %arg1[%c0_10, %c1_11, %c0_12] : memref<1x16x64xf32, #tpu.memory_space<vmem>>, vector<1x15x64xf32>
    %10 = vector.shape_cast %9 : vector<1x15x64xf32> to vector<15x64xf32>
    %c0_13 = arith.constant 0 : index
    %c128 = arith.constant 128 : index
    %11 = vector.load %arg9[%c0_13, %c128] : memref<16x192xf32, #tpu.memory_space<vmem>>, vector<15x64xf32>
    tpu.vector_store %arg9[%c0_13, %c128], %10 {strides = array<i32>} : memref<16x192xf32, #tpu.memory_space<vmem>>, vector<15x64xf32>,
    %c15 = arith.constant 15 : index
    %c128_14 = arith.constant 128 : index
    %12 = vector.load %arg9[%c15, %c128_14] : memref<16x192xf32, #tpu.memory_space<vmem>>, vector<1x64xf32>
    tpu.vector_store %arg9[%c15, %c128_14], %0 {strides = array<i32>} : memref<16x192xf32, #tpu.memory_space<vmem>>, vector<1x64xf32>,
    %c0_15 = arith.constant 0 : index
    %c0_16 = arith.constant 0 : index
    %13 = vector.load %arg9[%c0_15, %c0_16] : memref<16x192xf32, #tpu.memory_space<vmem>>, vector<16x192xf32>
    %c0_17 = arith.constant 0 : index
    %c0_18 = arith.constant 0 : index
    %14 = vector.load %arg3[%c0_17, %c0_18] : memref<192x512xf32, #tpu.memory_space<vmem>>, vector<192x512xf32>
    %cst_19 = arith.constant dense<0.000000e+00> : vector<16x512xf32>
    %15 = tpu.matmul %13, %14, %cst_19 {dimension_numbers = #tpu.dot_dimension_numbers<[1], [0], [0], [1], [0, 0, 1, 1], [], []>} : vector<16x192xf32>, vector<192x512xf32>, vector<16x512xf32> -> vector<16x512xf32>
    %c0_20 = arith.constant 0 : index
    %c0_21 = arith.constant 0 : index
    %16 = vector.load %arg2[%c0_20, %c0_21] : memref<1x512xf32, #tpu.memory_space<vmem>>, vector<1x512xf32>
    %17 = vector.broadcast %16 : vector<1x512xf32> to vector<16x512xf32>
    %18 = arith.addf %15, %17 : vector<16x512xf32>
    %19 = vector.extract_strided_slice %18 {offsets = [0, 0], sizes = [16, 256], strides = [1, 1]} : vector<16x512xf32> to vector<16x256xf32>
    %cst_22 = arith.constant 0.000000e+00 : f32
    %20 = vector.broadcast %cst_22 : f32 to vector<16x256xf32>
    %21 = arith.cmpf oge, %19, %20 : vector<16x256xf32>
    %cst_23 = arith.constant 0.00999999977 : f32
    %22 = vector.broadcast %cst_23 : f32 to vector<16x256xf32>
    %23 = arith.mulf %22, %19 : vector<16x256xf32>
    %24 = arith.select %21, %19, %23 : vector<16x256xi1>, vector<16x256xf32>
    %25 = vector.extract_strided_slice %18 {offsets = [0, 256], sizes = [16, 256], strides = [1, 1]} : vector<16x512xf32> to vector<16x256xf32>
    %c0_24 = arith.constant 0 : index
    %c0_25 = arith.constant 0 : index
    %c0_26 = arith.constant 0 : index
    %26 = vector.load %arg10[%c0_24, %c0_25, %c0_26] : memref<2x18x128xf32, #tpu.memory_space<vmem>>, vector<1x1x128xf32>
    %27 = vector.shape_cast %26 : vector<1x1x128xf32> to vector<1x128xf32>
    %28 = vector.shape_cast %1 : vector<1x128xf32> to vector<1x1x128xf32>
    tpu.vector_store %arg10[%c0_24, %c0_25, %c0_26], %28 {strides = array<i32>} : memref<2x18x128xf32, #tpu.memory_space<vmem>>, vector<1x1x128xf32>,
    %29 = vector.extract_strided_slice %24 {offsets = [0, 0], sizes = [16, 128], strides = [1, 1]} : vector<16x256xf32> to vector<16x128xf32>
    %c0_27 = arith.constant 0 : index
    %c1_28 = arith.constant 1 : index
    %c0_29 = arith.constant 0 : index
    %30 = vector.load %arg10[%c0_27, %c1_28, %c0_29] : memref<2x18x128xf32, #tpu.memory_space<vmem>>, vector<1x16x128xf32>
    %31 = vector.shape_cast %30 : vector<1x16x128xf32> to vector<16x128xf32>
    %32 = vector.shape_cast %29 : vector<16x128xf32> to vector<1x16x128xf32>
    tpu.vector_store %arg10[%c0_27, %c1_28, %c0_29], %32 {strides = array<i32>} : memref<2x18x128xf32, #tpu.memory_space<vmem>>, vector<1x16x128xf32>,
    %c0_30 = arith.constant 0 : index
    %c17 = arith.constant 17 : index
    %c0_31 = arith.constant 0 : index
    %33 = vector.load %arg10[%c0_30, %c17, %c0_31] : memref<2x18x128xf32, #tpu.memory_space<vmem>>, vector<1x1x128xf32>
    %34 = vector.shape_cast %33 : vector<1x1x128xf32> to vector<1x128xf32>
    %35 = vector.shape_cast %1 : vector<1x128xf32> to vector<1x1x128xf32>
    tpu.vector_store %arg10[%c0_30, %c17, %c0_31], %35 {strides = array<i32>} : memref<2x18x128xf32, #tpu.memory_space<vmem>>, vector<1x1x128xf32>,
    %c1_32 = arith.constant 1 : index
    %c0_33 = arith.constant 0 : index
    %c0_34 = arith.constant 0 : index
    %36 = vector.load %arg10[%c1_32, %c0_33, %c0_34] : memref<2x18x128xf32, #tpu.memory_space<vmem>>, vector<1x1x128xf32>
    %37 = vector.shape_cast %36 : vector<1x1x128xf32> to vector<1x128xf32>
    %38 = vector.shape_cast %1 : vector<1x128xf32> to vector<1x1x128xf32>
    tpu.vector_store %arg10[%c1_32, %c0_33, %c0_34], %38 {strides = array<i32>} : memref<2x18x128xf32, #tpu.memory_space<vmem>>, vector<1x1x128xf32>,
    %39 = vector.extract_strided_slice %24 {offsets = [0, 128], sizes = [16, 128], strides = [1, 1]} : vector<16x256xf32> to vector<16x128xf32>
    %c1_35 = arith.constant 1 : index
    %c1_36 = arith.constant 1 : index
    %c0_37 = arith.constant 0 : index
    %40 = vector.load %arg10[%c1_35, %c1_36, %c0_37] : memref<2x18x128xf32, #tpu.memory_space<vmem>>, vector<1x16x128xf32>
    %41 = vector.shape_cast %40 : vector<1x16x128xf32> to vector<16x128xf32>
    %42 = vector.shape_cast %39 : vector<16x128xf32> to vector<1x16x128xf32>
    tpu.vector_store %arg10[%c1_35, %c1_36, %c0_37], %42 {strides = array<i32>} : memref<2x18x128xf32, #tpu.memory_space<vmem>>, vector<1x16x128xf32>,
    %c1_38 = arith.constant 1 : index
    %c17_39 = arith.constant 17 : index
    %c0_40 = arith.constant 0 : index
    %43 = vector.load %arg10[%c1_38, %c17_39, %c0_40] : memref<2x18x128xf32, #tpu.memory_space<vmem>>, vector<1x1x128xf32>
    %44 = vector.shape_cast %43 : vector<1x1x128xf32> to vector<1x128xf32>
    %45 = vector.shape_cast %1 : vector<1x128xf32> to vector<1x1x128xf32>
    tpu.vector_store %arg10[%c1_38, %c17_39, %c0_40], %45 {strides = array<i32>} : memref<2x18x128xf32, #tpu.memory_space<vmem>>, vector<1x1x128xf32>,
    %c1_41 = arith.constant 1 : index
    %c0_42 = arith.constant 0 : index
    %c0_43 = arith.constant 0 : index
    %46 = vector.load %arg10[%c1_41, %c0_42, %c0_43] : memref<2x18x128xf32, #tpu.memory_space<vmem>>, vector<1x16x128xf32>
    %47 = vector.shape_cast %46 : vector<1x16x128xf32> to vector<16x128xf32>
    %c0_44 = arith.constant 0 : index
    %c1_45 = arith.constant 1 : index
    %c0_46 = arith.constant 0 : index
    %48 = vector.load %arg10[%c0_44, %c1_45, %c0_46] : memref<2x18x128xf32, #tpu.memory_space<vmem>>, vector<1x16x128xf32>
    %49 = vector.shape_cast %48 : vector<1x16x128xf32> to vector<16x128xf32>
    %c1_47 = arith.constant 1 : index
    %c1_48 = arith.constant 1 : index
    %c0_49 = arith.constant 0 : index
    %50 = vector.load %arg10[%c1_47, %c1_48, %c0_49] : memref<2x18x128xf32, #tpu.memory_space<vmem>>, vector<1x16x128xf32>
    %51 = vector.shape_cast %50 : vector<1x16x128xf32> to vector<16x128xf32>
    %52 = tpu.concatenate %47, %49, %51 in 1 : vector<16x128xf32>, vector<16x128xf32>, vector<16x128xf32> -> vector<16x384xf32>
    %c0_50 = arith.constant 0 : index
    %c0_51 = arith.constant 0 : index
    %53 = vector.load %arg4[%c0_50, %c0_51] : memref<384x128xf32, #tpu.memory_space<vmem>>, vector<384x128xf32>
    %cst_52 = arith.constant dense<0.000000e+00> : vector<16x128xf32>
    %54 = tpu.matmul %52, %53, %cst_52 {dimension_numbers = #tpu.dot_dimension_numbers<[1], [0], [0], [1], [0, 0, 1, 1], [], []>} : vector<16x384xf32>, vector<384x128xf32>, vector<16x128xf32> -> vector<16x128xf32>
    %c0_53 = arith.constant 0 : index
    %c0_54 = arith.constant 0 : index
    %55 = vector.load %arg5[%c0_53, %c0_54] : memref<1x128xf32, #tpu.memory_space<vmem>>, vector<1x128xf32>
    %56 = vector.broadcast %55 : vector<1x128xf32> to vector<16x128xf32>
    %57 = arith.addf %54, %56 : vector<16x128xf32>
    %58 = arith.mulf %57, %57 : vector<16x128xf32>
    %c0_55 = arith.constant 0 : index
    %c0_56 = arith.constant 0 : index
    %59 = vector.load %arg6[%c0_55, %c0_56] : memref<128x128xf32, #tpu.memory_space<vmem>>, vector<128x128xf32>
    %cst_57 = arith.constant dense<0.000000e+00> : vector<16x128xf32>
    %60 = tpu.matmul %58, %59, %cst_57 {dimension_numbers = #tpu.dot_dimension_numbers<[1], [0], [0], [1], [0, 0, 1, 1], [], []>} : vector<16x128xf32>, vector<128x128xf32>, vector<16x128xf32> -> vector<16x128xf32>
    %c0_58 = arith.constant 0 : index
    %c0_59 = arith.constant 0 : index
    %61 = vector.load %arg7[%c0_58, %c0_59] : memref<1x128xf32, #tpu.memory_space<vmem>>, vector<1x128xf32>
    %62 = vector.broadcast %61 : vector<1x128xf32> to vector<16x128xf32>
    %63 = arith.addf %60, %62 : vector<16x128xf32>
    %64 = math.sqrt %63 : vector<16x128xf32>
    %65 = arith.mulf %57, %64 : vector<16x128xf32>
    %66 = vector.extract_strided_slice %25 {offsets = [0, 0], sizes = [16, 128], strides = [1, 1]} : vector<16x256xf32> to vector<16x128xf32>
    %67 = arith.addf %65, %66 : vector<16x128xf32>
    %c0_60 = arith.constant 0 : index
    %c0_61 = arith.constant 0 : index
    %c0_62 = arith.constant 0 : index
    %c0_63 = arith.constant 0 : index
    %68 = vector.load %arg8[%c0_60, %c0_61, %c0_62, %c0_63] : memref<1x2x16x128xf32, #tpu.memory_space<vmem>>, vector<1x1x16x128xf32>
    %69 = vector.shape_cast %68 : vector<1x1x16x128xf32> to vector<16x128xf32>
    %70 = vector.shape_cast %67 : vector<16x128xf32> to vector<1x1x16x128xf32>
    tpu.vector_store %arg8[%c0_60, %c0_61, %c0_62, %c0_63], %70 {strides = array<i32>} : memref<1x2x16x128xf32, #tpu.memory_space<vmem>>, vector<1x1x16x128xf32>,
    %c0_64 = arith.constant 0 : index
    %c1_65 = arith.constant 1 : index
    %c0_66 = arith.constant 0 : index
    %71 = vector.load %arg10[%c0_64, %c1_65, %c0_66] : memref<2x18x128xf32, #tpu.memory_space<vmem>>, vector<1x16x128xf32>
    %72 = vector.shape_cast %71 : vector<1x16x128xf32> to vector<16x128xf32>
    %c1_67 = arith.constant 1 : index
    %c1_68 = arith.constant 1 : index
    %c0_69 = arith.constant 0 : index
    %73 = vector.load %arg10[%c1_67, %c1_68, %c0_69] : memref<2x18x128xf32, #tpu.memory_space<vmem>>, vector<1x16x128xf32>
    %74 = vector.shape_cast %73 : vector<1x16x128xf32> to vector<16x128xf32>
    %c0_70 = arith.constant 0 : index
    %c2 = arith.constant 2 : index
    %c0_71 = arith.constant 0 : index
    %75 = vector.load %arg10[%c0_70, %c2, %c0_71] : memref<2x18x128xf32, #tpu.memory_space<vmem>>, vector<1x16x128xf32>
    %76 = vector.shape_cast %75 : vector<1x16x128xf32> to vector<16x128xf32>
    %77 = tpu.concatenate %72, %74, %76 in 1 : vector<16x128xf32>, vector<16x128xf32>, vector<16x128xf32> -> vector<16x384xf32>
    %c0_72 = arith.constant 0 : index
    %c0_73 = arith.constant 0 : index
    %78 = vector.load %arg4[%c0_72, %c0_73] : memref<384x128xf32, #tpu.memory_space<vmem>>, vector<384x128xf32>
    %cst_74 = arith.constant dense<0.000000e+00> : vector<16x128xf32>
    %79 = tpu.matmul %77, %78, %cst_74 {dimension_numbers = #tpu.dot_dimension_numbers<[1], [0], [0], [1], [0, 0, 1, 1], [], []>} : vector<16x384xf32>, vector<384x128xf32>, vector<16x128xf32> -> vector<16x128xf32>
    %c0_75 = arith.constant 0 : index
    %c0_76 = arith.constant 0 : index
    %80 = vector.load %arg5[%c0_75, %c0_76] : memref<1x128xf32, #tpu.memory_space<vmem>>, vector<1x128xf32>
    %81 = vector.broadcast %80 : vector<1x128xf32> to vector<16x128xf32>
    %82 = arith.addf %79, %81 : vector<16x128xf32>
    %83 = arith.mulf %82, %82 : vector<16x128xf32>
    %c0_77 = arith.constant 0 : index
    %c0_78 = arith.constant 0 : index
    %84 = vector.load %arg6[%c0_77, %c0_78] : memref<128x128xf32, #tpu.memory_space<vmem>>, vector<128x128xf32>
    %cst_79 = arith.constant dense<0.000000e+00> : vector<16x128xf32>
    %85 = tpu.matmul %83, %84, %cst_79 {dimension_numbers = #tpu.dot_dimension_numbers<[1], [0], [0], [1], [0, 0, 1, 1], [], []>} : vector<16x128xf32>, vector<128x128xf32>, vector<16x128xf32> -> vector<16x128xf32>
    %c0_80 = arith.constant 0 : index
    %c0_81 = arith.constant 0 : index
    %86 = vector.load %arg7[%c0_80, %c0_81] : memref<1x128xf32, #tpu.memory_space<vmem>>, vector<1x128xf32>
    %87 = vector.broadcast %86 : vector<1x128xf32> to vector<16x128xf32>
    %88 = arith.addf %85, %87 : vector<16x128xf32>
    %89 = math.sqrt %88 : vector<16x128xf32>
    %90 = arith.mulf %82, %89 : vector<16x128xf32>
    %91 = vector.extract_strided_slice %25 {offsets = [0, 128], sizes = [16, 128], strides = [1, 1]} : vector<16x256xf32> to vector<16x128xf32>
    %92 = arith.addf %90, %91 : vector<16x128xf32>
    %c0_82 = arith.constant 0 : index
    %c1_83 = arith.constant 1 : index
    %c0_84 = arith.constant 0 : index
    %c0_85 = arith.constant 0 : index
    %93 = vector.load %arg8[%c0_82, %c1_83, %c0_84, %c0_85] : memref<1x2x16x128xf32, #tpu.memory_space<vmem>>, vector<1x1x16x128xf32>
    %94 = vector.shape_cast %93 : vector<1x1x16x128xf32> to vector<16x128xf32>
    %95 = vector.shape_cast %92 : vector<16x128xf32> to vector<1x1x16x128xf32>
    tpu.vector_store %arg8[%c0_82, %c1_83, %c0_84, %c0_85], %95 {strides = array<i32>} : memref<1x2x16x128xf32, #tpu.memory_space<vmem>>, vector<1x1x16x128xf32>,
    return
  }
  func.func @transform_0(%arg0: i32) -> (i32, i32, i32) {
    %c0_i32 = arith.constant 0 : i32
    %c0_i32_0 = arith.constant 0 : i32
    %c0_i32_1 = arith.constant 0 : i32
    return %arg0, %c0_i32, %c0_i32_0 : i32, i32, i32
  }
  func.func @transform_1(%arg0: i32) -> (i32, i32) {
    %c0_i32 = arith.constant 0 : i32
    %c0_i32_0 = arith.constant 0 : i32
    %c0_i32_1 = arith.constant 0 : i32
    return %c0_i32, %c0_i32_0 : i32, i32
  }
  func.func @transform_2(%arg0: i32) -> (i32, i32) {
    %c0_i32 = arith.constant 0 : i32
    %c0_i32_0 = arith.constant 0 : i32
    %c0_i32_1 = arith.constant 0 : i32
    return %c0_i32, %c0_i32_0 : i32, i32
  }
  func.func @transform_3(%arg0: i32) -> (i32, i32) {
    %c0_i32 = arith.constant 0 : i32
    %c0_i32_0 = arith.constant 0 : i32
    %c0_i32_1 = arith.constant 0 : i32
    return %c0_i32, %c0_i32_0 : i32, i32
  }
  func.func @transform_4(%arg0: i32) -> (i32, i32) {
    %c0_i32 = arith.constant 0 : i32
    %c0_i32_0 = arith.constant 0 : i32
    %c0_i32_1 = arith.constant 0 : i32
    return %c0_i32, %c0_i32_0 : i32, i32
  }
  func.func @transform_5(%arg0: i32) -> (i32, i32) {
    %c0_i32 = arith.constant 0 : i32
    %c0_i32_0 = arith.constant 0 : i32
    %c0_i32_1 = arith.constant 0 : i32
    return %c0_i32, %c0_i32_0 : i32, i32
  }
  func.func @transform_6(%arg0: i32) -> (i32, i32) {
    %c0_i32 = arith.constant 0 : i32
    %c0_i32_0 = arith.constant 0 : i32
    %c0_i32_1 = arith.constant 0 : i32
    return %c0_i32, %c0_i32_0 : i32, i32
  }
  func.func @transform_7(%arg0: i32) -> (i32, i32, i32, i32) {
    %c0_i32 = arith.constant 0 : i32
    %c0_i32_0 = arith.constant 0 : i32
    %c0_i32_1 = arith.constant 0 : i32
    %c0_i32_2 = arith.constant 0 : i32
    return %arg0, %c0_i32, %c0_i32_0, %c0_i32_1 : i32, i32, i32, i32
  }
}

</mosaic_0001>

<bundles_post_ra>
// kernel: tile.10
= control target key start
LH: loop header
LB: loop body
LE: loop exit
PB: predicated region body
PF: predicated region fallthrough
CT: control target
= control target key end

     0   :  { %s40_s0 = inlined_call_operand.vmem [shape: f32[4], index: 0, kind: input, shape index: {}]   ;;  %s41_s1 = inlined_call_operand.vmem [shape: f32[32,4], index: 1, kind: output, shape index: {}]  }
   0x1   :  { %v4_v0 = vld [vmem:[%s40_s0] ss:$0 sm:$0xff] }
   0x2   :  { %5 = vst [vmem:[%s41_s1] sm:$0xff] %v4_v0  ;;  %12 = vst [vmem:[%s41_s1 + $0x8] sm:$0xff] %v4_v0 }
   0x3   :  { %13 = vst [vmem:[%s41_s1 + $0x10] sm:$0xff] %v4_v0  ;;  %14 = vst [vmem:[%s41_s1 + $0x18] sm:$0xff] %v4_v0 }

// kernel: tile.11
= control target key start
LH: loop header
LB: loop body
LE: loop exit
PB: predicated region body
PF: predicated region fallthrough
CT: control target
= control target key end

     0   :  { %s261_s10 = smov 124   ;;  %s262_s11 = smov 116   ;;  %vm3_vm0 = vcmask 31744   ;;  %vm9_vm1 = vcmask 1048544   ;;  %vm15_vm2 = vcmask 1015744   ;;  %vm21_vm3 = vcmask 982944   ;;  %s401_s0 = inlined_call_operand.vmem [shape: f32[32,4], index: 0, kind: input, shape index: {}]   ;;  %s402_s1 = inlined_call_operand.vmem [shape: f32[1,128], index: 1, kind: output, shape index: {}]  }
   0x1   :  { %v199_v0 = vld [vmem:[%s401_s0 + $0x1f] sm:$0x1]   ;;  %v201_v1 = vld [vmem:[%s401_s0 + $0x1d] sm:$0x1]   ;;  %v200_v2 = vld [vmem:[%s401_s0 + $0x1e] sm:$0x1]  }
   0x2   :  { %7 = vrot.lane.b32.xlu0 %v199_v0, %s261_s10  ;;  %19 = vrot.lane.b32.xlu1 %v201_v1, %s262_s11  ;;  %v202_v3 = vld [vmem:[%s401_s0 + $0x1c] sm:$0x1]   ;;  %s263_s16 = smov 120   ;;  %s264_s17 = smov 112   ;;  %v203_v4 = vld [vmem:[%s401_s0 + $0x1b] sm:$0x1]  }
   0x3   :  { %v204_v5 = vld [vmem:[%s401_s0 + $0x1a] sm:$0x1]   ;;  %s265_s22 = smov 108   ;;  %s266_s23 = smov 104   ;;  %v205_v6 = vld [vmem:[%s401_s0 + $0x19] sm:$0x1]  }
   0x4   :  { %v206_v7 = vld [vmem:[%s401_s0 + $0x18] sm:$0x1]   ;;  %s267_s28 = smov 100   ;;  %s268_s29 = smov 96   ;;  %v207_v8 = vld [vmem:[%s401_s0 + $0x17] sm:$0x1]  }
   0x5   :  { %v208_v9 = vld [vmem:[%s401_s0 + $0x16] sm:$0x1]   ;;  %v2_v10 = vld [vmem:[%s401_s0] sm:$0x1]   ;;  %s269_s7 = smov 92   ;;  %s270_s8 = smov 88  }
   0x6   :  { %13 = vrot.lane.b32.xlu0 %v200_v2, %s263_s16  ;;  %25 = vrot.lane.b32.xlu1 %v202_v3, %s264_s17  ;;  %4 = vst.msk [vmem:[#allocation0] sm:$0x1] %vm3_vm0, %v2_v10   ;;  %v209_v11 = vld [vmem:[%s401_s0 + $0x15] sm:$0x1]   ;;  %v210_v12 = vld [vmem:[%s401_s0 + $0x14] sm:$0x1]  }
   0x7   :  { %s271_s13 = smov 84   ;;  %s272_s14 = smov 80   ;;  %v211_v13 = vld [vmem:[%s401_s0 + $0x13] sm:$0x1]   ;;  %v212_v14 = vld [vmem:[%s401_s0 + $0x12] sm:$0x1]  }
   0x8   :  { %s273_s19 = smov 76   ;;  %s274_s20 = smov 72   ;;  %v213_v15 = vld [vmem:[%s401_s0 + $0x11] sm:$0x1]   ;;  %v214_v16 = vld [vmem:[%s401_s0 + $0x10] sm:$0x1]  }
   0x9   :  { %s275_s25 = smov 68   ;;  %s276_s26 = smov 64   ;;  %v215_v17 = vld [vmem:[%s401_s0 + $0xf] sm:$0x1]   ;;  %v216_v18 = vld [vmem:[%s401_s0 + $0xe] sm:$0x1]  }
   0xa   :  { %31 = vrot.lane.b32.xlu0 %v203_v4, %s265_s22  ;;  %37 = vrot.lane.b32.xlu1 %v204_v5, %s266_s23  ;;  %s277_s2 = smov 60   ;;  %s278_s3 = smov 56   ;;  %v217_v19 = vld [vmem:[%s401_s0 + $0xd] sm:$0x1]   ;;  %v218_v20 = vld [vmem:[%s401_s0 + $0xc] sm:$0x1]  }
   0xb   :  { %s280_s9 = smov 48   ;;  %v219_v21 = vld [vmem:[%s401_s0 + $0xb] sm:$0x1]   ;;  %v220_v22 = vld [vmem:[%s401_s0 + $0xa] sm:$0x1]   ;;  %s282_s15 = smov 40  }
   0xc   :  { %v221_v23 = vld [vmem:[%s401_s0 + $0x9] sm:$0x1]   ;;  %v222_v24 = vld [vmem:[%s401_s0 + $0x8] sm:$0x1]   ;;  %s284_s21 = smov 32   ;;  %s286_s27 = smov 24  }
   0xd   :  { %v223_v25 = vld [vmem:[%s401_s0 + $0x7] sm:$0x1]   ;;  %v224_v26 = vld [vmem:[%s401_s0 + $0x6] sm:$0x1]   ;;  %v225_v27 = vld [vmem:[%s401_s0 + $0x5] sm:$0x1]  }
   0xe   :  { %43 = vrot.lane.b32.xlu0 %v205_v6, %s267_s28  ;;  %49 = vrot.lane.b32.xlu1 %v206_v7, %s268_s29  ;;  %v226_v28 = vld [vmem:[%s401_s0 + $0x4] sm:$0x1]   ;;  %s288_s4 = smov 16   ;;  %v227_v29 = vld [vmem:[%s401_s0 + $0x3] sm:$0x1]   ;;  %s290_s10 = smov 8  }
   0xf   :  { %v228_v30 = vld [vmem:[%s401_s0 + $0x2] sm:$0x1]   ;;  %v229_v31 = vld [vmem:[%s401_s0 + $0x1] sm:$0x1]   ;;  %s291_s0 = smov 4   ;;  %vm27_vm4 = vcmask 950144  }
  0x10   :  { %vm33_vm5 = vcmask 917344   ;;  %vm39_vm6 = vcmask 884544   ;;  %vm45_vm7 = vcmask 851744   ;;  %vm51_vm8 = vcmask 818944  }
  0x11   :  { %vm57_vm9 = vcmask 786144   ;;  %vm63_vm10 = vcmask 753344   ;;  %vm69_vm11 = vcmask 720544   ;;  %vm75_vm12 = vcmask 687744  }
  0x12   :  { %55 = vrot.lane.b32.xlu0 %v207_v8, %s269_s7  ;;  %61 = vrot.lane.b32.xlu1 %v208_v9, %s270_s8  ;;  %s279_s8 = smov 52   ;;  %vm81_vm13 = vcmask 654944   ;;  %vm87_vm14 = vcmask 622144   ;;  %vm93_vm15 = vcmask 589344   ;;  %vm99_vm0 = vcmask 556544  }
  0x16   :  { %67 = vrot.lane.b32.xlu0 %v209_v11, %s271_s13  ;;  %73 = vrot.lane.b32.xlu1 %v210_v12, %s272_s14  ;;  %s281_s14 = smov 44  }
  0x1a   :  { %79 = vrot.lane.b32.xlu0 %v211_v13, %s273_s19  ;;  %85 = vrot.lane.b32.xlu1 %v212_v14, %s274_s20  ;;  %s283_s20 = smov 36  }
  0x1e   :  { %91 = vrot.lane.b32.xlu0 %v213_v15, %s275_s25  ;;  %97 = vrot.lane.b32.xlu1 %v214_v16, %s276_s26  ;;  %s285_s26 = smov 28  }
  0x22   :  { %103 = vrot.lane.b32.xlu0 %v215_v17, %s277_s2  ;;  %109 = vrot.lane.b32.xlu1 %v216_v18, %s278_s3  ;;  %s287_s3 = smov 20  }
  0x26   :  { %115 = vrot.lane.b32.xlu0 %v217_v19, %s279_s8  ;;  %121 = vrot.lane.b32.xlu1 %v218_v20, %s280_s9  ;;  %s289_s9 = smov 12  }
  0x2a   :  { %127 = vrot.lane.b32.xlu0 %v219_v21, %s281_s14  ;;  %133 = vrot.lane.b32.xlu1 %v220_v22, %s282_s15 }
  0x2e   :  { %139 = vrot.lane.b32.xlu0 %v221_v23, %s283_s20  ;;  %145 = vrot.lane.b32.xlu1 %v222_v24, %s284_s21 }
  0x32   :  { %151 = vrot.lane.b32.xlu0 %v223_v25, %s285_s26  ;;  %157 = vrot.lane.b32.xlu1 %v224_v26, %s286_s27 }
  0x36   :  { %163 = vrot.lane.b32.xlu0 %v225_v27, %s287_s3  ;;  %169 = vrot.lane.b32.xlu1 %v226_v28, %s288_s4 }
  0x3a   :  { %175 = vrot.lane.b32.xlu0 %v227_v29, %s289_s9  ;;  %181 = vrot.lane.b32.xlu1 %v228_v30, %s290_s10 }
  0x3e   :  { %187 = vrot.lane.b32.xlu0 %v229_v31, %s291_s0 }
  0x74   :  { %v8_v32 = vpop.permute.xlu0 %7   ;;  %v20_v33 = vpop.permute.xlu1 %19  }
  0x75   :  { %10 = vst.msk [vmem:[#allocation0] sm:$0x1] %vm9_vm1, %v8_v32   ;;  %vm105_vm1 = vcmask 523744  }
  0x78   :  { %v14_v34 = vpop.permute.xlu0 %13   ;;  %v26_v35 = vpop.permute.xlu1 %25  }
  0x79   :  { %16 = vst.msk [vmem:[#allocation0] sm:$0x1] %vm15_vm2, %v14_v34   ;;  %vm111_vm2 = vcmask 490944  }
  0x7a   :  { %22 = vst.msk [vmem:[#allocation0] sm:$0x1] %vm21_vm3, %v20_v33   ;;  %vm117_vm3 = vcmask 458144  }
  0x7b   :  { %28 = vst.msk [vmem:[#allocation0] sm:$0x1] %vm27_vm4, %v26_v35   ;;  %vm123_vm4 = vcmask 425344  }
  0x7c   :  { %v32_v36 = vpop.permute.xlu0 %31   ;;  %v38_v37 = vpop.permute.xlu1 %37  }
  0x7d   :  { %34 = vst.msk [vmem:[#allocation0] sm:$0x1] %vm33_vm5, %v32_v36   ;;  %vm129_vm5 = vcmask 392544  }
  0x7e   :  { %40 = vst.msk [vmem:[#allocation0] sm:$0x1] %vm39_vm6, %v38_v37   ;;  %vm135_vm6 = vcmask 359744  }
  0x80   :  { %v44_v38 = vpop.permute.xlu0 %43   ;;  %v50_v39 = vpop.permute.xlu1 %49  }
  0x81   :  { %46 = vst.msk [vmem:[#allocation0] sm:$0x1] %vm45_vm7, %v44_v38   ;;  %vm141_vm7 = vcmask 326944  }
  0x82   :  { %52 = vst.msk [vmem:[#allocation0] sm:$0x1] %vm51_vm8, %v50_v39   ;;  %vm147_vm8 = vcmask 294144  }
  0x84   :  { %v56_v40 = vpop.permute.xlu0 %55   ;;  %v62_v41 = vpop.permute.xlu1 %61  }
  0x85   :  { %58 = vst.msk [vmem:[#allocation0] sm:$0x1] %vm57_vm9, %v56_v40   ;;  %vm153_vm9 = vcmask 261344  }
  0x86   :  { %64 = vst.msk [vmem:[#allocation0] sm:$0x1] %vm63_vm10, %v62_v41   ;;  %vm159_vm10 = vcmask 228544  }
  0x88   :  { %v68_v42 = vpop.permute.xlu0 %67   ;;  %v74_v43 = vpop.permute.xlu1 %73  }
  0x89   :  { %70 = vst.msk [vmem:[#allocation0] sm:$0x1] %vm69_vm11, %v68_v42   ;;  %vm165_vm11 = vcmask 195744  }
  0x8a   :  { %76 = vst.msk [vmem:[#allocation0] sm:$0x1] %vm75_vm12, %v74_v43   ;;  %vm171_vm12 = vcmask 162944  }
  0x8c   :  { %v80_v44 = vpop.permute.xlu0 %79   ;;  %v86_v45 = vpop.permute.xlu1 %85  }
  0x8d   :  { %82 = vst.msk [vmem:[#allocation0] sm:$0x1] %vm81_vm13, %v80_v44   ;;  %vm177_vm13 = vcmask 130144  }
  0x8e   :  { %88 = vst.msk [vmem:[#allocation0] sm:$0x1] %vm87_vm14, %v86_v45   ;;  %vm183_vm14 = vcmask 97344  }
  0x90   :  { %v92_v46 = vpop.permute.xlu0 %91   ;;  %v98_v47 = vpop.permute.xlu1 %97  }
  0x91   :  { %94 = vst.msk [vmem:[#allocation0] sm:$0x1] %vm93_vm15, %v92_v46   ;;  %vm189_vm15 = vcmask 64544  }
  0x92   :  { %100 = vst.msk [vmem:[#allocation0] sm:$0x1] %vm99_vm0, %v98_v47  }
  0x94   :  { %v104_v48 = vpop.permute.xlu0 %103   ;;  %v110_v49 = vpop.permute.xlu1 %109  }
  0x95   :  { %106 = vst.msk [vmem:[#allocation0] sm:$0x1] %vm105_vm1, %v104_v48  }
  0x96   :  { %112 = vst.msk [vmem:[#allocation0] sm:$0x1] %vm111_vm2, %v110_v49  }
  0x98   :  { %v116_v50 = vpop.permute.xlu0 %115   ;;  %v122_v51 = vpop.permute.xlu1 %121  }
  0x99   :  { %118 = vst.msk [vmem:[#allocation0] sm:$0x1] %vm117_vm3, %v116_v50  }
  0x9a   :  { %124 = vst.msk [vmem:[#allocation0] sm:$0x1] %vm123_vm4, %v122_v51  }
  0x9c   :  { %v128_v52 = vpop.permute.xlu0 %127   ;;  %v134_v53 = vpop.permute.xlu1 %133  }
  0x9d   :  { %130 = vst.msk [vmem:[#allocation0] sm:$0x1] %vm129_vm5, %v128_v52  }
  0x9e   :  { %136 = vst.msk [vmem:[#allocation0] sm:$0x1] %vm135_vm6, %v134_v53  }
  0xa0   :  { %v140_v54 = vpop.permute.xlu0 %139   ;;  %v146_v55 = vpop.permute.xlu1 %145  }
  0xa1   :  { %142 = vst.msk [vmem:[#allocation0] sm:$0x1] %vm141_vm7, %v140_v54  }
  0xa2   :  { %148 = vst.msk [vmem:[#allocation0] sm:$0x1] %vm147_vm8, %v146_v55  }
  0xa4   :  { %v152_v56 = vpop.permute.xlu0 %151   ;;  %v158_v57 = vpop.permute.xlu1 %157  }
  0xa5   :  { %154 = vst.msk [vmem:[#allocation0] sm:$0x1] %vm153_vm9, %v152_v56  }
  0xa6   :  { %160 = vst.msk [vmem:[#allocation0] sm:$0x1] %vm159_vm10, %v158_v57  }
  0xa8   :  { %v164_v58 = vpop.permute.xlu0 %163   ;;  %v170_v59 = vpop.permute.xlu1 %169  }
  0xa9   :  { %166 = vst.msk [vmem:[#allocation0] sm:$0x1] %vm165_vm11, %v164_v58  }
  0xaa   :  { %172 = vst.msk [vmem:[#allocation0] sm:$0x1] %vm171_vm12, %v170_v59  }
  0xac   :  { %v176_v60 = vpop.permute.xlu0 %175   ;;  %v182_v61 = vpop.permute.xlu1 %181  }
  0xad   :  { %178 = vst.msk [vmem:[#allocation0] sm:$0x1] %vm177_vm13, %v176_v60  }
  0xae   :  { %184 = vst.msk [vmem:[#allocation0] sm:$0x1] %vm183_vm14, %v182_v61  }
  0xb0   :  { %v188_v62 = vpop.permute.xlu0 %187  }
  0xb1   :  { %190 = vst.msk [vmem:[#allocation0] sm:$0x1] %vm189_vm15, %v188_v62  }
  0xb8   :  { %v195_v63 = vld [vmem:[#allocation0] sm:$0x1] }
  0xb9   :  { %198 = vst [vmem:[%s402_s1] sm:$0x1] %v195_v63 }

// kernel: _lambda_.1
= control target key start
LH: loop header
LB: loop body
LE: loop exit
PB: predicated region body
PF: predicated region fallthrough
CT: control target
= control target key end

     0   :  { %s1714_s24 = smov 0   ;;  %s2533_s0 = inlined_call_operand.vmem [shape: f32[2,16,64], index: 0, kind: input, shape index: {}]   ;;  %s2534_s1 = inlined_call_operand.vmem [shape: f32[1,512], index: 1, kind: input, shape index: {}]   ;;  %s2535_s2 = inlined_call_operand.vmem [shape: f32[192,512], index: 2, kind: input, shape index: {}]   ;;  %s2536_s3 = inlined_call_operand.vmem [shape: f32[384,128], index: 3, kind: input, shape index: {}]   ;;  %s2537_s4 = inlined_call_operand.vmem [shape: f32[1,128], index: 4, kind: input, shape index: {}]   ;;  %s2538_s5 = inlined_call_operand.vmem [shape: f32[128,128], index: 5, kind: input, shape index: {}]   ;;  %s2539_s6 = inlined_call_operand.vmem [shape: f32[1,128], index: 6, kind: input, shape index: {}]   ;;  %s2540_s7 = inlined_call_operand.vmem [shape: f32[2,2,16,128], index: 7, kind: output, shape index: {}]  }
   0x1 LB: > { %s1335_s25 = sadd.s32 4294967295, %s1670_s24   ;;  %p1339_p0 = scmp.ge.s32.totalorder %s1670_s24, 1  ;;  %s1670_s24 = sphi %s1714_s24, %s17_s24  }
   0x2   : > { %p237_p1 = scmp.lt.s32.totalorder %s1670_s24, 3 }
   0x4   : > { %p238_p2 = pnand %p1339_p0, %p237_p1 }
   0x6   : > { %241 = sbr.rel (%p238_p2) target bundleno = 1008 (0x3f0), region = 48 }
   0xb   : > { %p269_p3 = scmp.lt.s32.totalorder %s1335_s25, 1  ;;  %v379_v0 = vld [vmem:[%s2535_s2 + $0x1e8] sm:$0xff]  ;;  %v381_v1 = vld [vmem:[%s2535_s2 + $0x1f8] sm:$0xff]  ;;  %v378_v2 = vld [vmem:[%s2535_s2 + $0x1e0] sm:$0xff]  ;;  %vm279_vm0 = vcmask 516096   ;;  %v1672_v9 = vmov 0.0  }
   0xc   : > { %442 = vmatprep.subr.mxu0 %v379_v0  ;;  %519 = vmatprep.subr.mxu1 %v381_v1  ;;  %v380_v3 = vld [vmem:[%s2535_s2 + $0x1f0] sm:$0xff]  ;;  %v375_v4 = vld [vmem:[%s2535_s2 + $0x1c8] sm:$0xff]  ;;  %v377_v5 = vld [vmem:[%s2535_s2 + $0x1d8] sm:$0xff]  ;;  %280 = vst.msk [vmem:[#allocation2] sm:$0x1] %vm279_vm0, %v1672_v9  ;;  %vm311_vm1 = vcmask 522240  }
   0xd   : > { %s2546_s25 = smov (!%p269_p3, %s1335_s25), 1  ;;  %443 = vmatpush1.msra.mxu0 %v378_v2  ;;  %520 = vmatpush1.msra.mxu1 %v380_v3  ;;  %v374_v6 = vld [vmem:[%s2535_s2 + $0x1c0] sm:$0xff]  ;;  %v376_v7 = vld [vmem:[%s2535_s2 + $0x1d0] sm:$0xff]  ;;  %v371_v8 = vld [vmem:[%s2535_s2 + $0x1a8] sm:$0xff]  ;;  %313 = vst.msk [vmem:[#allocation2 + $0x1f] sm:$0x1] %vm279_vm0, %v1672_v9 }
   0xe   : > { %611 = vst [vmem:[#allocation3 + $0x11] sm:$0x1] %v1672_v9  ;;  %613 = vst [vmem:[#allocation3 + $0x18] sm:$0x1] %v1672_v9  ;;  %444 = vmatprep.subr.mxu0 %v375_v4  ;;  %521 = vmatprep.subr.mxu1 %v377_v5  ;;  %v373_v10 = vld [vmem:[%s2535_s2 + $0x1b8] sm:$0xff]  ;;  %v370_v11 = vld [vmem:[%s2535_s2 + $0x1a0] sm:$0xff] }
   0xf   : > { %v372_v12 = vld [vmem:[%s2535_s2 + $0x1b0] sm:$0xff]  ;;  %s1356_s29 = sshll.u32 %s2546_s25, 4  ;;  %445 = vmatpush1.msra.mxu0 %v374_v6  ;;  %522 = vmatpush1.msra.mxu1 %v376_v7  ;;  %v367_v13 = vld [vmem:[%s2535_s2 + $0x188] sm:$0xff]  ;;  %v369_v14 = vld [vmem:[%s2535_s2 + $0x198] sm:$0xff]  ;;  %vm293_vm2 = vcmask 523264   ;;  %vm291_vm3 = vcmask 523265  }
  0x10   : > { %s1770_s13 = scalar_lea.vmem %s2533_s0, %s1356_s29  ;;  %446 = vmatprep.subr.mxu0 %v371_v8  ;;  %523 = vmatprep.subr.mxu1 %v373_v10  ;;  %v366_v15 = vld [vmem:[%s2535_s2 + $0x180] sm:$0xff]  ;;  %v368_v16 = vld [vmem:[%s2535_s2 + $0x190] sm:$0xff]  ;;  %v363_v17 = vld [vmem:[%s2535_s2 + $0x168] sm:$0xff]  ;;  %s1673_s20 = smov 64   ;;  %vm285_vm4 = vcmask 1040384   ;;  %vm305_vm5 = vcmask 1048064  }
  0x11   : > { %v1782_v18 = vld [vmem:[%s1770_s13] sm:$0xff]  ;;  %v309_v20 = vld [vmem:[%s1770_s13 + $0x9] sm:$0x7f]  ;;  %447 = vmatpush1.msra.mxu0 %v370_v11  ;;  %524 = vmatpush1.msra.mxu1 %v372_v12  ;;  %v365_v21 = vld [vmem:[%s2535_s2 + $0x178] sm:$0xff] }
  0x12   : > { %v308_v19 = vld [vmem:[%s1770_s13 + $0x1] sm:$0xff]  ;;  %312 = vst.msk [vmem:[#allocation2 + $0x18] sm:$0x7f] %vm311_vm1, %v309_v20  ;;  %299 = vrot.lane.b32.xlu0 %v1782_v18, %s1673_s20  ;;  %448 = vmatprep.subr.mxu0 %v367_v13  ;;  %v286_v23 = vrot.slane %v1782_v18, 7  ;;  %v364_v25 = vld [vmem:[%s2535_s2 + $0x170] sm:$0xff]  ;;  %v361_v27 = vld [vmem:[%s2535_s2 + $0x158] sm:$0xff] }
  0x13   : > { %v362_v22 = vld [vmem:[%s2535_s2 + $0x160] sm:$0xff]  ;;  %310 = vst.msk [vmem:[#allocation2 + $0x8] sm:$0xff] %vm293_vm2, %v308_v19  ;;  %v296_v24 = vld [vmem:[%s1770_s13 + $0x8] sm:$0xff]  ;;  %525 = vmatprep.subr.mxu1 %v369_v14  ;;  %449 = vmatpush1.msra.mxu0 %v366_v15  ;;  %v360_v29 = vld [vmem:[%s2535_s2 + $0x150] sm:$0xff] }
  0x14   : > { %526 = vmatpush1.msra.mxu1 %v368_v16  ;;  %450 = vmatprep.subr.mxu0 %v363_v17  ;;  %v359_v26 = vld [vmem:[%s2535_s2 + $0x148] sm:$0xff]  ;;  %292 = vst.msk [vmem:[#allocation2] sm:$0xfe] %vm291_vm3, %v286_v23  ;;  %v358_v28 = vld [vmem:[%s2535_s2 + $0x140] sm:$0xff]  ;;  %v357_v31 = vld [vmem:[%s2535_s2 + $0x138] sm:$0xff] }
  0x15   : > { %527 = vmatprep.subr.mxu1 %v365_v21  ;;  %451 = vmatpush1.msra.mxu0 %v362_v22  ;;  %v355_v30 = vld [vmem:[%s2535_s2 + $0x128] sm:$0xff]  ;;  %v354_v32 = vld [vmem:[%s2535_s2 + $0x120] sm:$0xff]  ;;  %v356_v33 = vld [vmem:[%s2535_s2 + $0x130] sm:$0xff] }
  0x16   : > { %301 = vrot.lane.b32.xlu0 %v296_v24, %s1673_s20  ;;  %528 = vmatpush1.msra.mxu1 %v364_v25  ;;  %v351_v34 = vld [vmem:[%s2535_s2 + $0x108] sm:$0xff]  ;;  %v353_v35 = vld [vmem:[%s2535_s2 + $0x118] sm:$0xff]  ;;  %v350_v36 = vld [vmem:[%s2535_s2 + $0x100] sm:$0xff]  ;;  %s1357_s20 = sshll.u32 %s2546_s25, 5 }
  0x17   : > { %452 = vmatprep.subr.mxu0 %v359_v26  ;;  %529 = vmatprep.subr.mxu1 %v361_v27  ;;  %v352_v37 = vld [vmem:[%s2535_s2 + $0x110] sm:$0xff]  ;;  %v347_v38 = vld [vmem:[%s2535_s2 + $0xe8] sm:$0xff]  ;;  %v349_v39 = vld [vmem:[%s2535_s2 + $0xf8] sm:$0xff]  ;;  %s2516_s28 = scalar_lea.vmem %s2540_s7, %s1357_s20 }
  0x18   : > { %453 = vmatpush1.msra.mxu0 %v358_v28  ;;  %530 = vmatpush1.msra.mxu1 %v360_v29  ;;  %v346_v40 = vld [vmem:[%s2535_s2 + $0xe0] sm:$0xff]  ;;  %v348_v41 = vld [vmem:[%s2535_s2 + $0xf0] sm:$0xff]  ;;  %v343_v42 = vld [vmem:[%s2535_s2 + $0xc8] sm:$0xff] }
  0x19   : > { %454 = vmatprep.subr.mxu0 %v355_v30  ;;  %531 = vmatprep.subr.mxu1 %v357_v31  ;;  %v345_v43 = vld [vmem:[%s2535_s2 + $0xd8] sm:$0xff]  ;;  %v342_v44 = vld [vmem:[%s2535_s2 + $0xc0] sm:$0xff]  ;;  %v344_v45 = vld [vmem:[%s2535_s2 + $0xd0] sm:$0xff] }
  0x1a   : > { %455 = vmatpush1.msra.mxu0 %v354_v32  ;;  %532 = vmatpush1.msra.mxu1 %v356_v33  ;;  %v339_v46 = vld [vmem:[%s2535_s2 + $0xa8] sm:$0xff]  ;;  %v341_v47 = vld [vmem:[%s2535_s2 + $0xb8] sm:$0xff]  ;;  %v338_v48 = vld [vmem:[%s2535_s2 + $0xa0] sm:$0xff] }
  0x1b   : > { %456 = vmatprep.subr.mxu0 %v351_v34  ;;  %533 = vmatprep.subr.mxu1 %v353_v35  ;;  %v340_v49 = vld [vmem:[%s2535_s2 + $0xb0] sm:$0xff]  ;;  %v335_v50 = vld [vmem:[%s2535_s2 + $0x88] sm:$0xff]  ;;  %v337_v51 = vld [vmem:[%s2535_s2 + $0x98] sm:$0xff] }
  0x1c   : > { %457 = vmatpush1.msra.mxu0 %v350_v36  ;;  %534 = vmatpush1.msra.mxu1 %v352_v37  ;;  %v334_v52 = vld [vmem:[%s2535_s2 + $0x80] sm:$0xff]  ;;  %v336_v53 = vld [vmem:[%s2535_s2 + $0x90] sm:$0xff]  ;;  %v331_v54 = vld [vmem:[%s2535_s2 + $0x68] sm:$0xff] }
  0x1d   : > { %458 = vmatprep.subr.mxu0 %v347_v38  ;;  %535 = vmatprep.subr.mxu1 %v349_v39  ;;  %v333_v55 = vld [vmem:[%s2535_s2 + $0x78] sm:$0xff]  ;;  %v330_v56 = vld [vmem:[%s2535_s2 + $0x60] sm:$0xff]  ;;  %v332_v57 = vld [vmem:[%s2535_s2 + $0x70] sm:$0xff] }
  0x1e   : > { %459 = vmatpush1.msra.mxu0 %v346_v40  ;;  %536 = vmatpush1.msra.mxu1 %v348_v41  ;;  %v327_v58 = vld [vmem:[%s2535_s2 + $0x48] sm:$0xff]  ;;  %v329_v59 = vld [vmem:[%s2535_s2 + $0x58] sm:$0xff]  ;;  %v326_v60 = vld [vmem:[%s2535_s2 + $0x40] sm:$0xff] }
  0x1f   : > { %460 = vmatprep.subr.mxu0 %v343_v42  ;;  %537 = vmatprep.subr.mxu1 %v345_v43  ;;  %v328_v61 = vld [vmem:[%s2535_s2 + $0x50] sm:$0xff]  ;;  %v323_v62 = vld [vmem:[%s2535_s2 + $0x28] sm:$0xff]  ;;  %v325_v63 = vld [vmem:[%s2535_s2 + $0x38] sm:$0xff] }
  0x20   : > { %461 = vmatpush1.msra.mxu0 %v342_v44  ;;  %538 = vmatpush1.msra.mxu1 %v344_v45  ;;  %v322_v0 = vld [vmem:[%s2535_s2 + $0x20] sm:$0xff]  ;;  %v324_v1 = vld [vmem:[%s2535_s2 + $0x30] sm:$0xff]  ;;  %v319_v2 = vld [vmem:[%s2535_s2 + $0x8] sm:$0xff] }
  0x21   : > { %462 = vmatprep.subr.mxu0 %v339_v46  ;;  %539 = vmatprep.subr.mxu1 %v341_v47  ;;  %v321_v3 = vld [vmem:[%s2535_s2 + $0x18] sm:$0xff]  ;;  %v318_v4 = vld [vmem:[%s2535_s2] sm:$0xff]  ;;  %v320_v5 = vld [vmem:[%s2535_s2 + $0x10] sm:$0xff] }
  0x22   : > { %463 = vmatpush1.msra.mxu0 %v338_v48  ;;  %540 = vmatpush1.msra.mxu1 %v340_v49  ;;  %v282_v6 = vld [vmem:[%s1770_s13 + $0x8] sm:$0x7f]  ;;  %v413_v8 = vld [vmem:[%s2535_s2 + $0x2f8] sm:$0xff]  ;;  %v410_v10 = vld [vmem:[%s2535_s2 + $0x2e0] sm:$0xff] }
  0x23   : > { %464 = vmatprep.subr.mxu0 %v335_v50  ;;  %541 = vmatprep.subr.mxu1 %v337_v51  ;;  %v411_v7 = vld [vmem:[%s2535_s2 + $0x2e8] sm:$0xff]  ;;  %v287_v9 = vrot.slane %v282_v6, 7  ;;  %v412_v11 = vld [vmem:[%s2535_s2 + $0x2f0] sm:$0xff]  ;;  %v409_v13 = vld [vmem:[%s2535_s2 + $0x2d8] sm:$0xff] }
  0x24   : > { %465 = vmatpush1.msra.mxu0 %v334_v52  ;;  %542 = vmatpush1.msra.mxu1 %v336_v53  ;;  %v407_v12 = vld [vmem:[%s2535_s2 + $0x2c8] sm:$0xff]  ;;  %v406_v15 = vld [vmem:[%s2535_s2 + $0x2c0] sm:$0xff]  ;;  %v408_v16 = vld [vmem:[%s2535_s2 + $0x2d0] sm:$0xff] }
  0x25   : > { %466 = vmatprep.subr.mxu0 %v331_v54  ;;  %543 = vmatprep.subr.mxu1 %v333_v55  ;;  %v288_v14 = vsel %vm285_vm4, %v286_v23, %v287_v9  ;;  %v403_v17 = vld [vmem:[%s2535_s2 + $0x2a8] sm:$0xff]  ;;  %v405_v18 = vld [vmem:[%s2535_s2 + $0x2b8] sm:$0xff]  ;;  %v402_v19 = vld [vmem:[%s2535_s2 + $0x2a0] sm:$0xff] }
  0x26   : > { %467 = vmatpush1.msra.mxu0 %v330_v56  ;;  %544 = vmatpush1.msra.mxu1 %v332_v57  ;;  %294 = vst.msk [vmem:[#allocation2 + $0x10] sm:$0xff] %vm293_vm2, %v288_v14  ;;  %v404_v20 = vld [vmem:[%s2535_s2 + $0x2b0] sm:$0xff]  ;;  %v399_v21 = vld [vmem:[%s2535_s2 + $0x288] sm:$0xff]  ;;  %v401_v22 = vld [vmem:[%s2535_s2 + $0x298] sm:$0xff] }
  0x27   : > { %468 = vmatprep.subr.mxu0 %v327_v58  ;;  %545 = vmatprep.subr.mxu1 %v329_v59  ;;  %v398_v23 = vld [vmem:[%s2535_s2 + $0x280] sm:$0xff]  ;;  %v400_v24 = vld [vmem:[%s2535_s2 + $0x290] sm:$0xff]  ;;  %v395_v25 = vld [vmem:[%s2535_s2 + $0x268] sm:$0xff] }
  0x28   : > { %469 = vmatpush1.msra.mxu0 %v326_v60  ;;  %546 = vmatpush1.msra.mxu1 %v328_v61  ;;  %v397_v26 = vld [vmem:[%s2535_s2 + $0x278] sm:$0xff]  ;;  %v394_v27 = vld [vmem:[%s2535_s2 + $0x260] sm:$0xff]  ;;  %v396_v28 = vld [vmem:[%s2535_s2 + $0x270] sm:$0xff] }
  0x29   : > { %470 = vmatprep.subr.mxu0 %v323_v62  ;;  %547 = vmatprep.subr.mxu1 %v325_v63  ;;  %v391_v29 = vld [vmem:[%s2535_s2 + $0x248] sm:$0xff]  ;;  %v393_v30 = vld [vmem:[%s2535_s2 + $0x258] sm:$0xff]  ;;  %v390_v31 = vld [vmem:[%s2535_s2 + $0x240] sm:$0xff] }
  0x2a   : > { %471 = vmatpush1.msra.mxu0 %v322_v0  ;;  %548 = vmatpush1.msra.mxu1 %v324_v1  ;;  %v392_v32 = vld [vmem:[%s2535_s2 + $0x250] sm:$0xff]  ;;  %v387_v33 = vld [vmem:[%s2535_s2 + $0x228] sm:$0xff]  ;;  %v389_v34 = vld [vmem:[%s2535_s2 + $0x238] sm:$0xff] }
  0x2b   : > { %472 = vmatprep.subr.mxu0 %v319_v2  ;;  %549 = vmatprep.subr.mxu1 %v321_v3  ;;  %v386_v35 = vld [vmem:[%s2535_s2 + $0x220] sm:$0xff]  ;;  %v388_v36 = vld [vmem:[%s2535_s2 + $0x230] sm:$0xff]  ;;  %v383_v37 = vld [vmem:[%s2535_s2 + $0x208] sm:$0xff] }
  0x2c   : > { %473 = vmatpush1.msra.mxu0 %v318_v4  ;;  %550 = vmatpush1.msra.mxu1 %v320_v5  ;;  %v385_v38 = vld [vmem:[%s2535_s2 + $0x218] sm:$0xff]  ;;  %v382_v39 = vld [vmem:[%s2535_s2 + $0x200] sm:$0xff]  ;;  %v315_v40 = vld [vmem:[#allocation2 + $0x8] sm:$0xff] }
  0x2d   : > { %490 = vmatprep.subr.mxu0 %v411_v7  ;;  %567 = vmatprep.subr.mxu1 %v413_v8  ;;  %v384_v41 = vld [vmem:[%s2535_s2 + $0x210] sm:$0xff]  ;;  %v2038_v42 = vld [vmem:[%s2536_s3 + $0xf8] sm:$0xff]  ;;  %v2077_v53 = vld [vmem:[%s2536_s3 + $0xe8] sm:$0xff] }
  0x2e   : > { %491 = vmatpush2.msra.mxu0 %v410_v10  ;;  %568 = vmatpush2.msra.mxu1 %v412_v11  ;;  %v2043_v43 = vld [vmem:[%s2536_s3 + $0x178] sm:$0xff]  ;;  %v2057_v49 = vld [vmem:[%s2536_s3 + $0xf0] sm:$0xff]  ;;  %v2083_v54 = vld [vmem:[%s2536_s3 + $0x168] sm:$0xff] }
  0x2f   : > { %492 = vmatprep.subr.mxu0 %v407_v12  ;;  %569 = vmatprep.subr.mxu1 %v409_v13  ;;  %v317_v46 = vld [vmem:[#allocation2 + $0x18] sm:$0xff]  ;;  %v2062_v50 = vld [vmem:[%s2536_s3 + $0x170] sm:$0xff]  ;;  %v2088_v55 = vld [vmem:[%s2536_s3 + $0x68] sm:$0xff] }
  0x30   : > { %493 = vmatpush2.msra.mxu0 %v406_v15  ;;  %570 = vmatpush2.msra.mxu1 %v408_v16  ;;  %v2052_v48 = vld [vmem:[%s2536_s3 + $0x78] sm:$0xff]  ;;  %v2070_v51 = vld [vmem:[%s2536_s3 + $0x70] sm:$0xff]  ;;  %v2094_v56 = vld [vmem:[%s2536_s3 + $0xe0] sm:$0xff] }
  0x31   : > { %494 = vmatprep.subr.mxu0 %v403_v17  ;;  %571 = vmatprep.subr.mxu1 %v405_v18  ;;  %v2100_v57 = vld [vmem:[%s2536_s3 + $0x160] sm:$0xff]  ;;  %v2113_v59 = vld [vmem:[%s2536_s3 + $0xd8] sm:$0xff]  ;;  %v2132_v62 = vld [vmem:[%s2536_s3 + $0xd0] sm:$0xff] }
  0x32   : > { %495 = vmatpush2.msra.mxu0 %v402_v19  ;;  %572 = vmatpush2.msra.mxu1 %v404_v20  ;;  %v2106_v58 = vld [vmem:[%s2536_s3 + $0x60] sm:$0xff]  ;;  %v2119_v60 = vld [vmem:[%s2536_s3 + $0x158] sm:$0xff]  ;;  %v2138_v63 = vld [vmem:[%s2536_s3 + $0x150] sm:$0xff] }
  0x33   : > { %496 = vmatprep.subr.mxu0 %v399_v21  ;;  %573 = vmatprep.subr.mxu1 %v401_v22  ;;  %v2125_v61 = vld [vmem:[%s2536_s3 + $0x58] sm:$0xff]  ;;  %v2144_v0 = vld [vmem:[%s2536_s3 + $0x50] sm:$0xff]  ;;  %v2151_v1 = vld [vmem:[%s2536_s3 + $0xc8] sm:$0xff] }
  0x34   : > { %497 = vmatpush2.msra.mxu0 %v398_v23  ;;  %574 = vmatpush2.msra.mxu1 %v400_v24  ;;  %v2157_v2 = vld [vmem:[%s2536_s3 + $0x148] sm:$0xff]  ;;  %v2170_v4 = vld [vmem:[%s2536_s3 + $0xc0] sm:$0xff]  ;;  %v2194_v7 = vld [vmem:[%s2536_s3 + $0x138] sm:$0xff] }
  0x35   : > { %498 = vmatprep.subr.mxu0 %v395_v25  ;;  %575 = vmatprep.subr.mxu1 %v397_v26  ;;  %v2163_v3 = vld [vmem:[%s2536_s3 + $0x48] sm:$0xff]  ;;  %v2177_v5 = vld [vmem:[%s2536_s3 + $0x40] sm:$0xff]  ;;  %v2201_v8 = vld [vmem:[%s2536_s3 + $0x130] sm:$0xff] }
  0x36   : > { %499 = vmatpush2.msra.mxu0 %v394_v27  ;;  %576 = vmatpush2.msra.mxu1 %v396_v28  ;;  %v2187_v6 = vld [vmem:[%s2536_s3 + $0x140] sm:$0xff]  ;;  %v2207_v9 = vld [vmem:[%s2536_s3 + $0xb8] sm:$0xff]  ;;  %v2213_v10 = vld [vmem:[%s2536_s3 + $0x128] sm:$0xff] }
  0x37   : > { %500 = vmatprep.subr.mxu0 %v391_v29  ;;  %577 = vmatprep.subr.mxu1 %v393_v30  ;;  %v2219_v11 = vld [vmem:[%s2536_s3 + $0x38] sm:$0xff]  ;;  %v2226_v12 = vld [vmem:[%s2536_s3 + $0xb0] sm:$0xff]  ;;  %v2232_v13 = vld [vmem:[%s2536_s3 + $0x120] sm:$0xff] }
  0x38   : > { %501 = vmatpush2.msra.mxu0 %v390_v31  ;;  %578 = vmatpush2.msra.mxu1 %v392_v32  ;;  %v2238_v14 = vld [vmem:[%s2536_s3 + $0x30] sm:$0xff]  ;;  %v2246_v15 = vld [vmem:[%s2536_s3 + $0x118] sm:$0xff]  ;;  %v2251_v16 = vld [vmem:[%s2536_s3 + $0xa8] sm:$0xff]  ;;  %v416_v32 = vlaneseq }
  0x39   : > { %502 = vmatprep.subr.mxu0 %v387_v33  ;;  %579 = vmatprep.subr.mxu1 %v389_v34  ;;  %v2258_v17 = vld [vmem:[%s2536_s3 + $0x28] sm:$0xff]  ;;  %v2264_v18 = vld [vmem:[%s2536_s3 + $0x110] sm:$0xff]  ;;  %v2270_v19 = vld [vmem:[%s2536_s3 + $0xa0] sm:$0xff] }
  0x3a   : > { %503 = vmatpush2.msra.mxu0 %v386_v35  ;;  %580 = vmatpush2.msra.mxu1 %v388_v36  ;;  %v2277_v20 = vld [vmem:[%s2536_s3 + $0x20] sm:$0xff]  ;;  %v2283_v21 = vld [vmem:[%s2536_s3 + $0x108] sm:$0xff]  ;;  %v2289_v22 = vld [vmem:[%s2536_s3 + $0x98] sm:$0xff]  ;;  %v2350_v33 = vshrl.u32 %v416_v32, 7 }
  0x3b   : > { %504 = vmatprep.subr.mxu0 %v383_v37  ;;  %581 = vmatprep.subr.mxu1 %v385_v38  ;;  %v2296_v23 = vld [vmem:[%s2536_s3 + $0x18] sm:$0xff]  ;;  %v2302_v24 = vld [vmem:[%s2536_s3 + $0x100] sm:$0xff]  ;;  %v2308_v25 = vld [vmem:[%s2536_s3 + $0x90] sm:$0xff] }
  0x3c   : > { %505 = vmatpush2.msra.mxu0 %v382_v39  ;;  %1344 = vmatprep.mubr.msk.f32.mxu0 %vm293_vm2, %v315_v40  ;;  %v2315_v26 = vld [vmem:[%s2536_s3 + $0x10] sm:$0xff]  ;;  %v2322_v27 = vld [vmem:[%s2536_s3 + $0x88] sm:$0xff]  ;;  %v2332_v29 = vld [vmem:[%s2536_s3 + $0x80] sm:$0xff]  ;;  %v418_v34 = vsub.s32 0, %v2350_v33  ;;  %v422_v36 = vsub.s32 1, %v2350_v33 }
  0x3d   : > { %582 = vmatpush2.msra.mxu1 %v384_v41  ;;  %1346 = vmatprep.mubr.msk.f32.mxu1 %vm293_vm2, %v315_v40  ;;  %v2327_v28 = vld [vmem:[%s2536_s3 + $0x8] sm:$0xff]  ;;  %v2339_v30 = vld [vmem:[%s2536_s3] sm:$0xff]  ;;  %v2347_v31 = vld [vmem:[%s2538_s5 + $0x78] sm:$0xff] }
  0x3e   : > { %1358 = vmatprep.subr.mxu0 %v2038_v42  ;;  %1506 = vmatprep.subr.mxu1 %v2043_v43  ;;  %v2356_v35 = vld [vmem:[%s2534_s1] sm:$0xf] }
  0x3f   : > { %2543 = vst [vmem:[#allocation4_spill] sm:$0xff] %v2356_v35  ;;  %v419_v37 = vrot.slane %v2356_v35, %v418_v34  ;;  %v423_v38 = vrot.slane %v2356_v35, %v422_v36 }
  0x84   : > { %v300_v44 = vpop.permute.xlu0 %299 }
  0x85   : > { %306 = vst.msk [vmem:[#allocation2] sm:$0xff] %vm305_vm5, %v300_v44 }
  0x88   : > { %v302_v45 = vpop.permute.xlu0 %301 }
  0x89   : > { %307 = vst.msk [vmem:[#allocation2 + $0x10] sm:$0xff] %vm305_vm5, %v302_v45 }
  0x8c   : > { %v314_v47 = vld [vmem:[#allocation2] sm:$0xff] }
  0x8d   : > { %507 = vmatmul.mubr.f32.vlgmr.msra.gmra.mxu0 %v314_v47  ;;  %584 = vmatmul.mubr.f32.vlgmr.msra.gmra.mxu1 %v314_v47 }
  0x8e   : > { %1345 = vmatprep.mubr.msk.f32.mxu0 %vm293_vm2, %v317_v46  ;;  %1347 = vmatprep.mubr.msk.f32.mxu1 %vm293_vm2, %v317_v46 }
  0x8f   : > { %1359 = vmatpush3.msra.mxu0 %v2052_v48  ;;  %1507 = vmatpush3.msra.mxu1 %v2043_v43 }
  0x90   : > { %v316_v52 = vld [vmem:[#allocation2 + $0x10] sm:$0xff]  ;;  %1360 = vmatprep.subr.mxu0 %v2057_v49  ;;  %1508 = vmatprep.subr.mxu1 %v2062_v50 }
  0x91   : > { %513 = vmatmul.mubr.f32.gmra.mxu0 %v316_v52  ;;  %590 = vmatmul.mubr.f32.gmra.mxu1 %v316_v52 }
  0x92   : > { %1361 = vmatpush3.msra.mxu0 %v2070_v51  ;;  %1509 = vmatpush3.msra.mxu1 %v2062_v50 }
  0x93   : > { %1362 = vmatprep.subr.mxu0 %v2077_v53  ;;  %1510 = vmatprep.subr.mxu1 %v2083_v54 }
  0x94   : > { %1363 = vmatpush3.msra.mxu0 %v2088_v55  ;;  %1511 = vmatpush3.msra.mxu1 %v2083_v54 }
  0x95   : > { %1364 = vmatprep.subr.mxu0 %v2094_v56  ;;  %1512 = vmatprep.subr.mxu1 %v2100_v57 }
  0x96   : > { %1365 = vmatpush3.msra.mxu0 %v2106_v58  ;;  %1513 = vmatpush3.msra.mxu1 %v2100_v57 }
  0x97   : > { %1366 = vmatprep.subr.mxu0 %v2113_v59  ;;  %1514 = vmatprep.subr.mxu1 %v2119_v60 }
  0x98   : > { %1367 = vmatpush3.msra.mxu0 %v2125_v61  ;;  %1515 = vmatpush3.msra.mxu1 %v2119_v60 }
  0x99   : > { %1368 = vmatprep.subr.mxu0 %v2132_v62  ;;  %1516 = vmatprep.subr.mxu1 %v2138_v63 }
  0x9a   : > { %1369 = vmatpush3.msra.mxu0 %v2144_v0  ;;  %1517 = vmatpush3.msra.mxu1 %v2138_v63 }
  0x9b   : > { %1370 = vmatprep.subr.mxu0 %v2151_v1  ;;  %1518 = vmatprep.subr.mxu1 %v2157_v2 }
  0x9c   : > { %1371 = vmatpush3.msra.mxu0 %v2163_v3  ;;  %1519 = vmatpush3.msra.mxu1 %v2157_v2 }
  0x9d   : > { %1372 = vmatprep.subr.mxu0 %v2170_v4  ;;  %1520 = vmatprep.subr.mxu1 %v2187_v6 }
  0x9e   : > { %1373 = vmatpush3.msra.mxu0 %v2177_v5  ;;  %1521 = vmatpush3.msra.mxu1 %v2187_v6 }
  0x9f   : > { %1522 = vmatprep.subr.mxu1 %v2194_v7  ;;  %1374 = vmatprep.subr.mxu0 %v2207_v9 }
  0xa0   : > { %1523 = vmatpush3.msra.mxu1 %v2194_v7  ;;  %1375 = vmatpush3.msra.mxu0 %v2219_v11 }
  0xa1   : > { %1524 = vmatprep.subr.mxu1 %v2201_v8  ;;  %1376 = vmatprep.subr.mxu0 %v2226_v12 }
  0xa2   : > { %1525 = vmatpush3.msra.mxu1 %v2201_v8  ;;  %1377 = vmatpush3.msra.mxu0 %v2238_v14 }
  0xa3   : > { %1526 = vmatprep.subr.mxu1 %v2213_v10  ;;  %1378 = vmatprep.subr.mxu0 %v2251_v16 }
  0xa4   : > { %1527 = vmatpush3.msra.mxu1 %v2213_v10  ;;  %1379 = vmatpush3.msra.mxu0 %v2258_v17 }
  0xa5   : > { %1528 = vmatprep.subr.mxu1 %v2232_v13  ;;  %1380 = vmatprep.subr.mxu0 %v2270_v19 }
  0xa6   : > { %1529 = vmatpush3.msra.mxu1 %v2232_v13  ;;  %1381 = vmatpush3.msra.mxu0 %v2277_v20 }
  0xa7   : > { %1530 = vmatprep.subr.mxu1 %v2246_v15  ;;  %1382 = vmatprep.subr.mxu0 %v2289_v22 }
  0xa8   : > { %1531 = vmatpush3.msra.mxu1 %v2246_v15  ;;  %1383 = vmatpush3.msra.mxu0 %v2296_v23 }
  0xa9   : > { %1532 = vmatprep.subr.mxu1 %v2264_v18  ;;  %1384 = vmatprep.subr.mxu0 %v2308_v25 }
  0xaa   : > { %1533 = vmatpush3.msra.mxu1 %v2264_v18  ;;  %1385 = vmatpush3.msra.mxu0 %v2315_v26 }
  0xab   : > { %1534 = vmatprep.subr.mxu1 %v2283_v21  ;;  %1386 = vmatprep.subr.mxu0 %v2322_v27 }
  0xac   : > { %1535 = vmatpush3.msra.mxu1 %v2283_v21  ;;  %1387 = vmatpush3.msra.mxu0 %v2327_v28 }
  0xad   : > { %1536 = vmatprep.subr.mxu1 %v2302_v24  ;;  %1388 = vmatprep.subr.mxu0 %v2332_v29 }
  0xae   : > { %1537 = vmatpush3.msra.mxu1 %v2302_v24  ;;  %1389 = vmatpush3.msra.mxu0 %v2339_v30 }
  0xaf   : > { %1432 = vmatprep.subr.mxu1 %v2038_v42  ;;  %1541 = vmatprep.subr.mxu0 %v2347_v31 }
 0x14d   : > { %v508_v39 = vpop.f32.mrf.mxu0 }
 0x14e   : > { %v509_v40 = vadd.f32 %v508_v39, %v419_v37 }
 0x14f   : > { %v510_v41 = vpop.f32.mrf.mxu0 }
 0x150   : > { %vm596_vm6 = vcmp.ge.f32.partialorder %v509_v40, 0.0  ;;  %v600_v42 = vmul.f32 0.01, %v509_v40  ;;  %v511_v44 = vadd.f32 %v510_v41, %v423_v38 }
 0x151   : > { %v514_v45 = vpop.f32.mrf.mxu0 }
 0x152   : > { %v2361_v46 = vsel %vm596_vm6, %v509_v40, %v600_v42  ;;  %vm597_vm7 = vcmp.ge.f32.partialorder %v511_v44, 0.0  ;;  %v601_v47 = vmul.f32 0.01, %v511_v44  ;;  %v515_v52 = vadd.f32 %v514_v45, %v419_v37 }
 0x153   : > { %609 = vst [vmem:[#allocation3 + $0x1] sm:$0xff] %v2361_v46  ;;  %v516_v32 = vpop.f32.mrf.mxu0  ;;  %742 = vmatprep.mubr.f32.mxu0 %v2361_v46 }
 0x154   : > { %v605_v34 = vsel %vm597_vm7, %v511_v44, %v601_v47  ;;  %vm598_vm8 = vcmp.ge.f32.partialorder %v515_v52, 0.0  ;;  %v602_v36 = vmul.f32 0.01, %v515_v52  ;;  %v517_v35 = vadd.f32 %v516_v32, %v423_v38 }
 0x155   : > { %614 = vst [vmem:[#allocation3 + $0x19] sm:$0xff] %v605_v34  ;;  %1538 = vmatprep.mubr.f32.mxu1 %v605_v34 }
 0x156   : > { %v2365_v39 = vsel %vm598_vm8, %v515_v52, %v602_v36  ;;  %vm599_vm9 = vcmp.ge.f32.partialorder %v517_v35, 0.0  ;;  %v603_v41 = vmul.f32 0.01, %v517_v35 }
 0x157   : > { %610 = vst [vmem:[#allocation3 + $0x9] sm:$0xff] %v2365_v39 }
 0x158   : > { %v2368_v40 = vsel %vm599_vm9, %v517_v35, %v603_v41  ;;  %v844_v35 = vld [vmem:[%s2538_s5 + $0x70] sm:$0xff] }
 0x159   : > { %615 = vst [vmem:[#allocation3 + $0x21] sm:$0xff] %v2368_v40  ;;  %1539 = vmatmul.mubr.f32.vlgmr.msra.gmra.mxu1 %v2368_v40 }
 0x15a   : > { %1433 = vmatpush3.msra.mxu1 %v2052_v48  ;;  %1073 = vmatprep.mubr.f32.mxu1 %v605_v34 }
 0x15b   : > { %1434 = vmatprep.subr.mxu1 %v2057_v49  ;;  %v843_v49 = vld [vmem:[%s2538_s5 + $0x68] sm:$0xff] }
 0x15c   : > { %v617_v37 = vld [vmem:[#allocation3 + $0x18] sm:$0xff]  ;;  %1435 = vmatpush3.msra.mxu1 %v2070_v51  ;;  %v842_v51 = vld [vmem:[%s2538_s5 + $0x60] sm:$0xff] }
 0x15d   : > { %743 = vmatmul.mubr.f32.vlgmr.msra.gmra.mxu0 %v617_v37  ;;  %1436 = vmatprep.subr.mxu1 %v2077_v53  ;;  %v841_v53 = vld [vmem:[%s2538_s5 + $0x58] sm:$0xff] }
 0x15e   : > { %747 = vmatprep.mubr.f32.mxu0 %v2365_v39  ;;  %1437 = vmatpush3.msra.mxu1 %v2088_v55  ;;  %v840_v55 = vld [vmem:[%s2538_s5 + $0x50] sm:$0xff]  ;;  %v952_v44 = vld [vmem:[#allocation3 + $0x2] sm:$0xff] }
 0x15f   : > { %1438 = vmatprep.subr.mxu1 %v2094_v56  ;;  %1542 = vmatpush3.msra.mxu0 %v2347_v31  ;;  %v839_v56 = vld [vmem:[%s2538_s5 + $0x48] sm:$0xff] }
 0x160   : > { %v618_v48 = vld [vmem:[#allocation3 + $0x20] sm:$0xff]  ;;  %1439 = vmatpush3.msra.mxu1 %v2106_v58  ;;  %1543 = vmatprep.subr.mxu0 %v844_v35 }
 0x161   : > { %748 = vmatmul.mubr.f32.gmra.mxu0 %v618_v48  ;;  %1440 = vmatprep.subr.mxu1 %v2113_v59  ;;  %v838_v58 = vld [vmem:[%s2538_s5 + $0x40] sm:$0xff]  ;;  %v837_v59 = vld [vmem:[%s2538_s5 + $0x38] sm:$0xff] }
 0x162   : > { %1441 = vmatpush3.msra.mxu1 %v2125_v61  ;;  %1544 = vmatpush3.msra.mxu0 %v844_v35  ;;  %v836_v61 = vld [vmem:[%s2538_s5 + $0x30] sm:$0xff] }
 0x163   : > { %1442 = vmatprep.subr.mxu1 %v2132_v62  ;;  %1545 = vmatprep.subr.mxu0 %v843_v49  ;;  %v835_v62 = vld [vmem:[%s2538_s5 + $0x28] sm:$0xff] }
 0x164   : > { %1443 = vmatpush3.msra.mxu1 %v2144_v0  ;;  %1546 = vmatpush3.msra.mxu0 %v843_v49  ;;  %v834_v0 = vld [vmem:[%s2538_s5 + $0x20] sm:$0xff] }
 0x165   : > { %1444 = vmatprep.subr.mxu1 %v2151_v1  ;;  %1547 = vmatprep.subr.mxu0 %v842_v51  ;;  %v833_v1 = vld [vmem:[%s2538_s5 + $0x18] sm:$0xff] }
 0x166   : > { %1445 = vmatpush3.msra.mxu1 %v2163_v3  ;;  %1548 = vmatpush3.msra.mxu0 %v842_v51  ;;  %v832_v3 = vld [vmem:[%s2538_s5 + $0x10] sm:$0xff] }
 0x167   : > { %1446 = vmatprep.subr.mxu1 %v2170_v4  ;;  %1549 = vmatprep.subr.mxu0 %v841_v53  ;;  %v831_v4 = vld [vmem:[%s2538_s5 + $0x8] sm:$0xff] }
 0x168   : > { %1447 = vmatpush3.msra.mxu1 %v2177_v5  ;;  %1550 = vmatpush3.msra.mxu0 %v841_v53  ;;  %v830_v5 = vld [vmem:[%s2538_s5] sm:$0xff] }
 0x169   : > { %1448 = vmatprep.subr.mxu1 %v2207_v9  ;;  %1551 = vmatprep.subr.mxu0 %v840_v55  ;;  %v2456_v9 = vpop.f32.mrf.mxu1 }
 0x16a   : > { %1449 = vmatpush3.msra.mxu1 %v2219_v11  ;;  %1552 = vmatpush3.msra.mxu0 %v840_v55 }
 0x16b   : > { %1450 = vmatprep.subr.mxu1 %v2226_v12  ;;  %1553 = vmatprep.subr.mxu0 %v839_v56  ;;  %v2458_v11 = vpop.f32.mrf.mxu1 }
 0x16c   : > { %1451 = vmatpush3.msra.mxu1 %v2238_v14  ;;  %1554 = vmatpush3.msra.mxu0 %v839_v56 }
 0x16d   : > { %1452 = vmatprep.subr.mxu1 %v2251_v16  ;;  %1555 = vmatprep.subr.mxu0 %v838_v58  ;;  %v2460_v12 = vpop.f32.mrf.mxu1 }
 0x16e   : > { %1453 = vmatpush3.msra.mxu1 %v2258_v17  ;;  %1556 = vmatpush3.msra.mxu0 %v838_v58 }
 0x16f   : > { %1454 = vmatprep.subr.mxu1 %v2270_v19  ;;  %1557 = vmatprep.subr.mxu0 %v837_v59  ;;  %v2462_v14 = vpop.f32.mrf.mxu1 }
 0x170   : > { %1455 = vmatpush3.msra.mxu1 %v2277_v20  ;;  %1558 = vmatpush3.msra.mxu0 %v837_v59  ;;  %v2467_v20 = vld [vmem:[%s2537_s4] ss:$0 sm:$0xff] }
 0x171   : > { %1456 = vmatprep.subr.mxu1 %v2289_v22  ;;  %1559 = vmatprep.subr.mxu0 %v836_v61 }
 0x172   : > { %1457 = vmatpush3.msra.mxu1 %v2296_v23  ;;  %1560 = vmatpush3.msra.mxu0 %v836_v61 }
 0x173   : > { %1458 = vmatprep.subr.mxu1 %v2308_v25  ;;  %1561 = vmatprep.subr.mxu0 %v835_v62 }
 0x174   : > { %1459 = vmatpush3.msra.mxu1 %v2315_v26  ;;  %1562 = vmatpush3.msra.mxu0 %v835_v62 }
 0x175   : > { %1460 = vmatprep.subr.mxu1 %v2322_v27  ;;  %1563 = vmatprep.subr.mxu0 %v834_v0 }
 0x176   : > { %1461 = vmatpush3.msra.mxu1 %v2327_v28  ;;  %1564 = vmatpush3.msra.mxu0 %v834_v0 }
 0x177   : > { %1462 = vmatprep.subr.mxu1 %v2332_v29  ;;  %1565 = vmatprep.subr.mxu0 %v833_v1 }
 0x178   : > { %1463 = vmatpush3.msra.mxu1 %v2339_v30  ;;  %1566 = vmatpush3.msra.mxu0 %v833_v1 }
 0x179   : > { %1074 = vmatmul.mubr.f32.vlgmr.msra.gmra.mxu1 %v2361_v46  ;;  %1611 = vmatprep.subr.mxu1 %v2347_v31 }
 0x17a   : > { %1078 = vmatprep.mubr.f32.mxu1 %v2368_v40  ;;  %1612 = vmatpush3.msra.mxu1 %v2347_v31 }
 0x17b   : > { %1613 = vmatprep.subr.mxu1 %v844_v35  ;;  %1567 = vmatprep.subr.mxu0 %v832_v3 }
 0x17c   : > { %1614 = vmatpush3.msra.mxu1 %v844_v35  ;;  %1568 = vmatpush3.msra.mxu0 %v832_v3 }
 0x17d   : > { %1079 = vmatmul.mubr.f32.gmra.mxu1 %v2365_v39  ;;  %1615 = vmatprep.subr.mxu1 %v843_v49 }
 0x17e   : > { %1616 = vmatpush3.msra.mxu1 %v843_v49  ;;  %1569 = vmatprep.subr.mxu0 %v831_v4 }
 0x17f   : > { %1617 = vmatprep.subr.mxu1 %v842_v51  ;;  %1570 = vmatpush3.msra.mxu0 %v831_v4 }
 0x180   : > { %1618 = vmatpush3.msra.mxu1 %v842_v51  ;;  %1571 = vmatprep.subr.mxu0 %v830_v5 }
 0x181   : > { %1619 = vmatprep.subr.mxu1 %v841_v53  ;;  %1572 = vmatpush3.msra.mxu0 %v830_v5 }
 0x182   : > { %1620 = vmatpush3.msra.mxu1 %v841_v53  ;;  %1576 = vmatprep.subr.mxu0 %v2043_v43 }
 0x183   : > { %1621 = vmatprep.subr.mxu1 %v840_v55 }
 0x184   : > { %1622 = vmatpush3.msra.mxu1 %v840_v55 }
 0x185   : > { %1623 = vmatprep.subr.mxu1 %v839_v56 }
 0x186   : > { %1624 = vmatpush3.msra.mxu1 %v839_v56 }
 0x187   : > { %1625 = vmatprep.subr.mxu1 %v838_v58 }
 0x188   : > { %1626 = vmatpush3.msra.mxu1 %v838_v58 }
 0x189   : > { %1627 = vmatprep.subr.mxu1 %v837_v59 }
 0x18a   : > { %1628 = vmatpush3.msra.mxu1 %v837_v59 }
 0x18b   : > { %1629 = vmatprep.subr.mxu1 %v836_v61 }
 0x18c   : > { %1630 = vmatpush3.msra.mxu1 %v836_v61 }
 0x18d   : > { %1631 = vmatprep.subr.mxu1 %v835_v62 }
 0x18e   : > { %1632 = vmatpush3.msra.mxu1 %v835_v62 }
 0x18f   : > { %1633 = vmatprep.subr.mxu1 %v834_v0 }
 0x190   : > { %1634 = vmatpush3.msra.mxu1 %v834_v0 }
 0x191   : > { %1635 = vmatprep.subr.mxu1 %v833_v1 }
 0x192   : > { %1636 = vmatpush3.msra.mxu1 %v833_v1 }
 0x193   : > { %1637 = vmatprep.subr.mxu1 %v832_v3 }
 0x194   : > { %1638 = vmatpush3.msra.mxu1 %v832_v3 }
 0x195   : > { %1639 = vmatprep.subr.mxu1 %v831_v4 }
 0x196   : > { %1640 = vmatpush3.msra.mxu1 %v831_v4 }
 0x197   : > { %1641 = vmatprep.subr.mxu1 %v830_v5 }
 0x198   : > { %1642 = vmatpush3.msra.mxu1 %v830_v5 }
 0x219   : > { %v1540_v19 = vpop.f32.mrf.mxu1 }
 0x21b   : > { %v819_v27 = vpop.f32.mrf.mxu1 }
 0x21d   : > { %v1390_v16 = vpop.f32.mrf.mxu0 }
 0x21f   : > { %v1391_v17 = vpop.f32.mrf.mxu0 }
 0x220   : > { %v1392_v22 = vadd.f32 %v1391_v17, %v1390_v16 }
 0x221   : > { %v1393_v23 = vpop.f32.mrf.mxu0 }
 0x222   : > { %v745_v25 = vadd.f32 %v1392_v22, %v2467_v20 }
 0x223   : > { %v1394_v26 = vpop.f32.mrf.mxu0 }
 0x224   : > { %v1395_v28 = vadd.f32 %v1394_v26, %v1393_v23  ;;  %v2470_v29 = vadd.f32 %v819_v27, %v745_v25 }
 0x226   : > { %v750_v30 = vadd.f32 %v1395_v28, %v2467_v20  ;;  %v828_v31 = vmul.f32 %v2470_v29, %v2470_v29 }
 0x228   : > { %v825_v38 = vadd.f32 %v1540_v19, %v750_v30  ;;  %1573 = vmatprep.mubr.f32.mxu0 %v828_v31 }
 0x22a   : > { %v829_v42 = vmul.f32 %v825_v38, %v825_v38 }
 0x22c   : > { %1574 = vmatmul.mubr.f32.vlgmr.msra.gmra.mxu0 %v829_v42 }
 0x22d   : > { %1577 = vmatpush3.msra.mxu0 %v2043_v43  ;;  %1608 = vmatprep.mubr.f32.mxu0 %v952_v44  ;;  %v953_v43 = vld [vmem:[#allocation3 + $0xa] sm:$0xff] }
 0x22e   : > { %1578 = vmatprep.subr.mxu0 %v2062_v50 }
 0x22f   : > { %1579 = vmatpush3.msra.mxu0 %v2062_v50  ;;  %v1349_v50 = vld [vmem:[%s2539_s6] ss:$0 sm:$0xff] }
 0x230   : > { %1580 = vmatprep.subr.mxu0 %v2083_v54 }
 0x231   : > { %1581 = vmatpush3.msra.mxu0 %v2083_v54 }
 0x232   : > { %1582 = vmatprep.subr.mxu0 %v2100_v57 }
 0x233   : > { %1583 = vmatpush3.msra.mxu0 %v2100_v57 }
 0x234   : > { %1584 = vmatprep.subr.mxu0 %v2119_v60 }
 0x235   : > { %1585 = vmatpush3.msra.mxu0 %v2119_v60 }
 0x236   : > { %1586 = vmatprep.subr.mxu0 %v2138_v63 }
 0x237   : > { %1587 = vmatpush3.msra.mxu0 %v2138_v63 }
 0x238   : > { %1588 = vmatprep.subr.mxu0 %v2157_v2 }
 0x239   : > { %1589 = vmatpush3.msra.mxu0 %v2157_v2  ;;  %v1464_v2 = vpop.f32.mrf.mxu1 }
 0x23a   : > { %1590 = vmatprep.subr.mxu0 %v2187_v6 }
 0x23b   : > { %1591 = vmatpush3.msra.mxu0 %v2187_v6  ;;  %v426_v6 = vsub.s32 2, %v2350_v33 }
 0x23c   : > { %1592 = vmatprep.subr.mxu0 %v2194_v7 }
 0x23d   : > { %1593 = vmatpush3.msra.mxu0 %v2194_v7 }
 0x23e   : > { %1594 = vmatprep.subr.mxu0 %v2201_v8 }
 0x23f   : > { %1595 = vmatpush3.msra.mxu0 %v2201_v8  ;;  %v1465_v8 = vpop.f32.mrf.mxu1 }
 0x240   : > { %1596 = vmatprep.subr.mxu0 %v2213_v10  ;;  %v1466_v51 = vadd.f32 %v1465_v8, %v1464_v2 }
 0x241   : > { %1597 = vmatpush3.msra.mxu0 %v2213_v10  ;;  %v1467_v52 = vpop.f32.mrf.mxu1 }
 0x242   : > { %1598 = vmatprep.subr.mxu0 %v2232_v13  ;;  %v1076_v56 = vadd.f32 %v1466_v51, %v2467_v20 }
 0x243   : > { %1599 = vmatpush3.msra.mxu0 %v2232_v13  ;;  %v1468_v35 = vpop.f32.mrf.mxu1 }
 0x244   : > { %1600 = vmatprep.subr.mxu0 %v2246_v15  ;;  %v1469_v49 = vadd.f32 %v1468_v35, %v1467_v52 }
 0x245   : > { %1601 = vmatpush3.msra.mxu0 %v2246_v15 }
 0x246   : > { %1602 = vmatprep.subr.mxu0 %v2264_v18  ;;  %v1081_v53 = vadd.f32 %v1469_v49, %v2467_v20 }
 0x247   : > { %1603 = vmatpush3.msra.mxu0 %v2264_v18  ;;  %v2544_v18 = vld [vmem:[#allocation4_spill] sm:$0xff] }
 0x248   : > { %1604 = vmatprep.subr.mxu0 %v2283_v21 }
 0x249   : > { %1605 = vmatpush3.msra.mxu0 %v2283_v21  ;;  %v427_v21 = vrot.slane %v2544_v18, %v426_v6 }
 0x24a   : > { %1606 = vmatprep.subr.mxu0 %v2302_v24 }
 0x24b   : > { %1607 = vmatpush3.msra.mxu0 %v2302_v24  ;;  %v592_v47 = vadd.f32 %v2460_v12, %v427_v21  ;;  %v586_v40 = vadd.f32 %v2456_v9, %v427_v21  ;;  %v430_v9 = vsub.s32 3, %v2350_v33 }
 0x24c   : > { %1609 = vmatmul.mubr.f32.vlgmr.msra.gmra.mxu0 %v953_v43 }
 0x24d   : > { %v431_v20 = vrot.slane %v2544_v18, %v430_v9 }
 0x24f   : > { %v594_v26 = vadd.f32 %v2462_v14, %v431_v20  ;;  %v588_v31 = vadd.f32 %v2458_v11, %v431_v20 }
 0x2ec   : > { %v1575_v54 = vpop.f32.mrf.mxu0 }
 0x2ed   : > { %v925_v57 = vadd.f32 %v1575_v54, %v1349_v50 }
 0x2ee   : > { %v919_v60 = vpop.f32.mrf.mxu0 }
 0x2ef   : > { %1656 = vrsqrt.f32 %v925_v57  ;;  %v920_v63 = vadd.f32 %v1349_v50, %v919_v60  ;;  %vm937_vm10 = vcmp.eq.f32.partialorder %v925_v57, inf  ;;  %v940_v13 = vand.u32 2147483648, %v925_v57 }
 0x2f0   : > { %vm939_vm11 = vcmp.eq.f32.partialorder %v925_v57, 0.0 }
 0x2f1   : > { %1658 = vrsqrt.f32 %v920_v63  ;;  %vm930_vm12 = vcmp.eq.f32.partialorder %v920_v63, inf  ;;  %v933_v34 = vand.u32 2147483648, %v920_v63  ;;  %vm932_vm13 = vcmp.eq.f32.partialorder %v920_v63, 0.0 }
 0x2fc   : > { %v1657_v7 = vpop.eup %1656 }
 0x2fd   : > { %v936_v10 = vmul.f32 %v1657_v7, %v925_v57 }
 0x2fe   : > { %v1659_v15 = vpop.eup %1658 }
 0x2ff   : > { %v938_v24 = vsel %vm937_vm10, %v925_v57, %v936_v10  ;;  %v929_v46 = vmul.f32 %v1659_v15, %v920_v63 }
 0x300   : > { %v941_v45 = vsel %vm939_vm11, %v940_v13, %v938_v24 }
 0x301   : > { %v943_v32 = vmul.f32 %v941_v45, %v825_v38  ;;  %v931_v36 = vsel %vm930_vm12, %v920_v63, %v929_v46 }
 0x302   : > { %v934_v41 = vsel %vm932_vm13, %v933_v34, %v931_v36 }
 0x303   : > { %v945_v39 = vadd.f32 %v943_v32, %v592_v47  ;;  %v942_v37 = vmul.f32 %v934_v41, %v2470_v29 }
 0x305   : > { %947 = vst [vmem:[%s2516_s28 + $0x8] sm:$0xff] %v945_v39  ;;  %v944_v48 = vadd.f32 %v942_v37, %v586_v40 }
 0x307   : > { %946 = vst [vmem:[%s2516_s28] sm:$0xff] %v944_v48 }
 0x30c   : > { %v1610_v55 = vpop.f32.mrf.mxu0 }
 0x30d   : > { %v1156_v58 = vadd.f32 %v1610_v55, %v1081_v53 }
 0x30e   : > { %v1150_v59 = vpop.f32.mrf.mxu0 }
 0x30f   : > { %v1151_v61 = vadd.f32 %v1150_v59, %v1076_v56  ;;  %v1160_v0 = vmul.f32 %v1156_v58, %v1156_v58 }
 0x311   : > { %v1159_v62 = vmul.f32 %v1151_v61, %v1151_v61 }
 0x313   : > { %1643 = vmatprep.mubr.f32.mxu1 %v1159_v62 }
 0x314   : > { %1644 = vmatmul.mubr.f32.vlgmr.msra.gmra.mxu1 %v1160_v0 }
 0x3d4   : > { %v1645_v1 = vpop.f32.mrf.mxu1 }
 0x3d5   : > { %v1256_v3 = vadd.f32 %v1645_v1, %v1349_v50 }
 0x3d6   : > { %v1250_v4 = vpop.f32.mrf.mxu1 }
 0x3d7   : > { %1660 = vrsqrt.f32 %v1256_v3  ;;  %v1251_v5 = vadd.f32 %v1349_v50, %v1250_v4  ;;  %vm1268_vm14 = vcmp.eq.f32.partialorder %v1256_v3, inf  ;;  %v1271_v17 = vand.u32 2147483648, %v1256_v3 }
 0x3d8   : > { %vm1270_vm15 = vcmp.eq.f32.partialorder %v1256_v3, 0.0 }
 0x3d9   : > { %1662 = vrsqrt.f32 %v1251_v5  ;;  %vm1261_vm0 = vcmp.eq.f32.partialorder %v1251_v5, inf  ;;  %v1264_v28 = vand.u32 2147483648, %v1251_v5  ;;  %vm1263_vm1 = vcmp.eq.f32.partialorder %v1251_v5, 0.0 }
 0x3e4   : > { %v1661_v12 = vpop.eup %1660 }
 0x3e5   : > { %v1267_v16 = vmul.f32 %v1661_v12, %v1256_v3 }
 0x3e6   : > { %v1663_v19 = vpop.eup %1662 }
 0x3e7   : > { %v1269_v22 = vsel %vm1268_vm14, %v1256_v3, %v1267_v16  ;;  %v1260_v25 = vmul.f32 %v1663_v19, %v1251_v5 }
 0x3e8   : > { %v1272_v23 = vsel %vm1270_vm15, %v1271_v17, %v1269_v22 }
 0x3e9   : > { %v1274_v27 = vmul.f32 %v1272_v23, %v1156_v58  ;;  %v1262_v29 = vsel %vm1261_vm0, %v1251_v5, %v1260_v25 }
 0x3ea   : > { %v1265_v30 = vsel %vm1263_vm1, %v1264_v28, %v1262_v29 }
 0x3eb   : > { %v1276_v33 = vadd.f32 %v1274_v27, %v594_v26  ;;  %v1273_v38 = vmul.f32 %v1265_v30, %v1151_v61 }
 0x3ed   : > { %1353 = vst [vmem:[%s2516_s28 + $0x18] sm:$0xff] %v1276_v33  ;;  %v1275_v42 = vadd.f32 %v1273_v38, %v588_v31 }
 0x3ef   : > { %1352 = vst [vmem:[%s2516_s28 + $0x10] sm:$0xff] %v1275_v42 }
 0x3f0 PF: > { %s17_s24 = sadd.s32 1, %s1670_s24  }
 0x3f1   : > { %p14_p4 = scmp.ge.s32.totalorder %s17_s24, 4  }
 0x3f3   :  { %16 = sbr.rel (!%p14_p4) target bundleno = 1 (0x1), region = 80 }

</bundles_post_ra>
